<compile_context>
chip_gen: v5e
topology: v5e:2x2
jax: 0.10.0
libtpu: 0.0.40
codegen_flags: <defaults>
</compile_context>

<pallas_src>
import functools
import math

import jax
import jax.numpy as jnp
from jax.experimental import pallas as pl
from jax.experimental.pallas import tpu as pltpu


def _round_up(x, m):
    return ((x + m - 1) // m) * m


# ----------------------------------------------------------------------------
# Parameter construction (mirrors SineLayer.init_weights + nn.Linear bias init)
# ----------------------------------------------------------------------------
def init_sine_layer_params(key, in_features, out_features, *,
                           is_first=False, omega_0=30.0):
    """PyTorch-style params: weight (out_features, in_features), bias (out_features,)."""
    kw, kb = jax.random.split(key)
    if is_first:
        bound_w = 1.0 / in_features
    else:
        bound_w = math.sqrt(6.0 / in_features) / omega_0
    bound_b = 1.0 / math.sqrt(in_features)      # nn.Linear default bias init
    w = jax.random.uniform(kw, (out_features, in_features), jnp.float32,
                           -bound_w, bound_w)
    b = jax.random.uniform(kb, (out_features,), jnp.float32, -bound_b, bound_b)
    return w, b


# ----------------------------------------------------------------------------
# Pallas kernel: one (TN_rows, F) output tile, natural row-major layout.
# ----------------------------------------------------------------------------
def _sine_layer_kernel(use_vpu_fma, x_ref, wt_ref, b_ref, o_ref):
    # x_ref: (TN, K)   wt_ref: (K, F)   b_ref: (1, F)   o_ref: (TN, F)
    # omega_0 is already folded into wt/b by the wrapper -> plain sin() here.
    wt = wt_ref[...]
    b = b_ref[...]
    if use_vpu_fma:
        # Tiny fan-in (SIREN coordinate layers): K broadcast FMAs on the VPU
        # instead of a near-empty MXU pass.
        x = x_ref[...]
        z = x[:, 0:1] * wt[0:1, :] + b
        for k in range(1, wt.shape[0]):
            z = z + x[:, k:k + 1] * wt[k:k + 1, :]
    else:
        # Wider fan-in: MXU matmul with explicit f32 operand precision so the
        # default does not silently drop to a single bf16 pass.
        z = jax.lax.dot_general(
            x_ref[...], wt,
            dimension_numbers=(((1,), (0,)), ((), ())),
            precision=jax.lax.Precision.HIGHEST,
            preferred_element_type=jnp.float32,
        ) + b
    o_ref[...] = jnp.sin(z).astype(o_ref.dtype)


# ----------------------------------------------------------------------------
# Wrapper: tile rows (sublane axis), keep params resident, no transposes/pads.
# ----------------------------------------------------------------------------
def sine_layer_forward(x, weight, bias, *, omega_0=30.0, tn_rows=1024,
                       vpu_k_max=8, out_dtype=jnp.float32):
    """x: (..., in_features) -> (..., out_features)."""
    lead_shape = x.shape[:-1]
    in_features = x.shape[-1]
    out_features = weight.shape[0]

    x2 = x.reshape(-1, in_features).astype(jnp.float32)        # natural (N, K)
    n_rows = x2.shape[0]

    # Fold omega_0 into the parameters (exact to one rounding) and pre-transpose
    # the small weight once so the kernel contracts (N, K) @ (K, F).
    wt = (jnp.asarray(weight, jnp.float32) * jnp.float32(omega_0)).T
    bb = (jnp.asarray(bias, jnp.float32) * jnp.float32(omega_0)).reshape(1, out_features)

    # ---- Row-tile selection: multiple of 8 (sublane), >= 2 grid steps when
    # possible (v7x dual-TC), ragged tail left to Pallas (no jnp.pad).
    if n_rows <= 8:
        tn_eff = n_rows                         # single full-extent block
    else:
        tn_eff = min(int(tn_rows), _round_up(pl.cdiv(n_rows, 2), 8))
        tn_eff = max(8, tn_eff)

    # ---- Generation-aware VMEM cap (v7x: 64 MiB/TC; v5e/v6e: 128 MiB).
    try:
        vmem_cap = int(pltpu.get_tpu_info().vmem_capacity_bytes)
    except Exception:
        vmem_cap = 64 * 1024 * 1024             # conservative fallback (v7x per-TC)

    def _tile_bytes(t):
        # double-buffered x/out tiles + (resident, double-buffered) params
        return 4 * (2 * t * in_features + 2 * t * out_features
                    + 2 * (in_features + 1) * out_features)

    while tn_eff > 8 and _tile_bytes(tn_eff) > vmem_cap // 2:
        tn_eff = max(8, _round_up(tn_eff // 2, 8))
    vmem_limit = int(min(max(2 * _tile_bytes(tn_eff), 32 * 1024 * 1024), vmem_cap))

    grid = (pl.cdiv(n_rows, tn_eff),)
    use_vpu_fma = in_features <= vpu_k_max
    kernel = functools.partial(_sine_layer_kernel, use_vpu_fma)

    out_itemsize = jnp.dtype(out_dtype).itemsize
    cost = pl.CostEstimate(
        flops=2 * n_rows * in_features * out_features,
        transcendentals=n_rows * out_features,
        bytes_accessed=(4 * n_rows * in_features
                        + out_itemsize * n_rows * out_features
                        + 4 * (in_features + 1) * out_features),
    )

    y2 = pl.pallas_call(
        kernel,
        out_shape=jax.ShapeDtypeStruct((n_rows, out_features), out_dtype),
        grid_spec=pltpu.PrefetchScalarGridSpec(
            num_scalar_prefetch=0,
            grid=grid,
            in_specs=[
                pl.BlockSpec((tn_eff, in_features), lambda i: (i, 0)),
                pl.BlockSpec((in_features, out_features), lambda i: (0, 0)),
                pl.BlockSpec((1, out_features), lambda i: (0, 0)),
            ],
            out_specs=pl.BlockSpec((tn_eff, out_features), lambda i: (i, 0)),
        ),
        compiler_params=pltpu.CompilerParams(
            dimension_semantics=("parallel",),
            vmem_limit_bytes=vmem_limit,
        ),
        cost_estimate=cost,
    )(x2, wt, bb)

    return y2.reshape(*lead_shape, out_features)


# ----------------------------------------------------------------------------
# Pure-JAX elementwise reference (precision-unambiguous: no TPU matmul).
# ----------------------------------------------------------------------------
def sine_layer_reference(x, weight, bias, *, omega_0=30.0):
    z = jnp.sum(x[..., None, :].astype(jnp.float32) * weight.astype(jnp.float32),
                axis=-1) + bias
    return jnp.sin(omega_0 * z)


if __name__ == "__main__":
    key = jax.random.PRNGKey(0)
    omega_0 = 30.0
    k1, k2, k3, kx1, kx2, kx3 = jax.random.split(key, 6)

    # --- Case 1: first SIREN layer on 2-D coordinates (VPU-FMA path). -------
    # 2*8*8 = 128 rows -> two 64-row grid steps (keeps v7x's 2 TCs busy).
    w1, b1 = init_sine_layer_params(k1, 2, 32, is_first=True, omega_0=omega_0)
    x1 = jax.random.uniform(kx1, (2, 8, 8, 2), jnp.float32, -1.0, 1.0)
    y1 = sine_layer_forward(x1, w1, b1, omega_0=omega_0)
    jax.block_until_ready(y1)
    assert y1.shape == (2, 8, 8, 32), y1.shape
    err1 = float(jnp.max(jnp.abs(y1 - sine_layer_reference(x1, w1, b1, omega_0=omega_0))))
    assert err1 < 1e-3, err1

    # --- Case 2: hidden SineLayer 64 -> 128 (f32 MXU path, lane-dense out). --
    w2, b2 = init_sine_layer_params(k2, 64, 128, is_first=False, omega_0=omega_0)
    x2 = jax.random.uniform(kx2, (2, 8, 8, 64), jnp.float32, -1.0, 1.0)
    y2 = sine_layer_forward(x2, w2, b2, omega_0=omega_0)
    jax.block_until_ready(y2)
    assert y2.shape == (2, 8, 8, 128), y2.shape
    err2 = float(jnp.max(jnp.abs(y2 - sine_layer_reference(x2, w2, b2, omega_0=omega_0))))
    assert err2 < 1e-3, err2

    # --- Case 3: ragged row count (5*21 = 105 rows, not a tile multiple). ----
    w3, b3 = init_sine_layer_params(k3, 64, 128, is_first=False, omega_0=omega_0)
    x3 = jax.random.uniform(kx3, (5, 21, 64), jnp.float32, -1.0, 1.0)
    y3 = sine_layer_forward(x3, w3, b3, omega_0=omega_0)
    jax.block_until_ready(y3)
    assert y3.shape == (5, 21, 128), y3.shape
    err3 = float(jnp.max(jnp.abs(y3 - sine_layer_reference(x3, w3, b3, omega_0=omega_0))))
    assert err3 < 1e-3, err3

    print("KERNEL_OK")
</pallas_src>

<mosaic_0001>
module attributes {stable_mosaic.version = 11 : i64} {
  func.func @_sine_layer_kernel(%arg0: i32, %arg1: memref<64x2xf32, #tpu.memory_space<vmem>>, %arg2: memref<2x32xf32, #tpu.memory_space<vmem>>, %arg3: memref<1x32xf32, #tpu.memory_space<vmem>>, %arg4: memref<64x32xf32, #tpu.memory_space<vmem>>) attributes {dimension_semantics = [#tpu.dimension_semantics<parallel>], iteration_bounds = array<i64: 2>, scalar_prefetch = 0 : i64, scratch_operands = 0 : i64, tpu.core_type = #tpu.core_type<tc>, window_params = [{transform_indices = @transform_0, window_bounds = array<i64: 64, 2>}, {pipeline_mode = #tpu.pipeline_mode<synchronous>, transform_indices = @transform_1, window_bounds = array<i64: 2, 32>}, {pipeline_mode = #tpu.pipeline_mode<synchronous>, transform_indices = @transform_2, window_bounds = array<i64: 1, 32>}, {transform_indices = @transform_3, window_bounds = array<i64: 64, 32>}]} {
    %c0 = arith.constant 0 : index
    %c0_0 = arith.constant 0 : index
    %0 = vector.load %arg2[%c0, %c0_0] : memref<2x32xf32, #tpu.memory_space<vmem>>, vector<2x32xf32>
    %c0_1 = arith.constant 0 : index
    %c0_2 = arith.constant 0 : index
    %1 = vector.load %arg3[%c0_1, %c0_2] : memref<1x32xf32, #tpu.memory_space<vmem>>, vector<1x32xf32>
    %c0_3 = arith.constant 0 : index
    %c0_4 = arith.constant 0 : index
    %2 = vector.load %arg1[%c0_3, %c0_4] : memref<64x2xf32, #tpu.memory_space<vmem>>, vector<64x2xf32>
    %3 = vector.extract_strided_slice %2 {offsets = [0, 0], sizes = [64, 1], strides = [1, 1]} : vector<64x2xf32> to vector<64x1xf32>
    %4 = vector.extract_strided_slice %0 {offsets = [0, 0], sizes = [1, 32], strides = [1, 1]} : vector<2x32xf32> to vector<1x32xf32>
    %5 = vector.broadcast %3 : vector<64x1xf32> to vector<64x32xf32>
    %6 = vector.broadcast %4 : vector<1x32xf32> to vector<64x32xf32>
    %7 = arith.mulf %5, %6 : vector<64x32xf32>
    %8 = vector.broadcast %1 : vector<1x32xf32> to vector<64x32xf32>
    %9 = arith.addf %7, %8 : vector<64x32xf32>
    %10 = vector.extract_strided_slice %2 {offsets = [0, 1], sizes = [64, 1], strides = [1, 1]} : vector<64x2xf32> to vector<64x1xf32>
    %11 = vector.extract_strided_slice %0 {offsets = [1, 0], sizes = [1, 32], strides = [1, 1]} : vector<2x32xf32> to vector<1x32xf32>
    %12 = vector.broadcast %10 : vector<64x1xf32> to vector<64x32xf32>
    %13 = vector.broadcast %11 : vector<1x32xf32> to vector<64x32xf32>
    %14 = arith.mulf %12, %13 : vector<64x32xf32>
    %15 = arith.addf %9, %14 : vector<64x32xf32>
    %16 = math.sin %15 : vector<64x32xf32>
    %c0_5 = arith.constant 0 : index
    %c0_6 = arith.constant 0 : index
    %17 = vector.load %arg4[%c0_5, %c0_6] : memref<64x32xf32, #tpu.memory_space<vmem>>, vector<64x32xf32>
    tpu.vector_store %arg4[%c0_5, %c0_6], %16 {strides = array<i32>} : memref<64x32xf32, #tpu.memory_space<vmem>>, vector<64x32xf32>,
    return
  }
  func.func @transform_0(%arg0: i32) -> (i32, i32) {
    %c0_i32 = arith.constant 0 : i32
    %c0_i32_0 = arith.constant 0 : i32
    return %arg0, %c0_i32 : i32, i32
  }
  func.func @transform_1(%arg0: i32) -> (i32, i32) {
    %c0_i32 = arith.constant 0 : i32
    %c0_i32_0 = arith.constant 0 : i32
    %c0_i32_1 = arith.constant 0 : i32
    return %c0_i32, %c0_i32_0 : i32, i32
  }
  func.func @transform_2(%arg0: i32) -> (i32, i32) {
    %c0_i32 = arith.constant 0 : i32
    %c0_i32_0 = arith.constant 0 : i32
    %c0_i32_1 = arith.constant 0 : i32
    return %c0_i32, %c0_i32_0 : i32, i32
  }
  func.func @transform_3(%arg0: i32) -> (i32, i32) {
    %c0_i32 = arith.constant 0 : i32
    %c0_i32_0 = arith.constant 0 : i32
    return %arg0, %c0_i32 : i32, i32
  }
}

</mosaic_0001>

<bundles_post_ra>
// kernel: tpu_custom_call.1
= control target key start
LH: loop header
LB: loop body
LE: loop exit
PB: predicated region body
PF: predicated region fallthrough
CT: control target
= control target key end

     0   :  { %s1693_s12 = smov 0   ;;  %s2611_s0 = inlined_call_operand.vmem [shape: f32[128,2], index: 0, kind: input, shape index: {}]   ;;  %s2612_s1 = inlined_call_operand.vmem [shape: f32[2,32], index: 1, kind: input, shape index: {}]   ;;  %s2613_s2 = inlined_call_operand.vmem [shape: f32[1,32], index: 2, kind: input, shape index: {}]   ;;  %s2614_s3 = inlined_call_operand.vmem [shape: f32[128,32], index: 3, kind: output, shape index: {}]  }
   0x1 LB: > { %s1598_s13 = sadd.s32 4294967295, %s1663_s12   ;;  %p1602_p0 = scmp.ge.s32.totalorder %s1663_s12, 1  ;;  %s1663_s12 = sphi %s1693_s12, %s13_s12  }
   0x2   : > { %p138_p1 = scmp.lt.s32.totalorder %s1663_s12, 3 }
   0x4   : > { %p139_p2 = pnand %p1602_p0, %p138_p1 }
   0x5   : > { %s1603_s14 = sshll.u32 (!%p139_p2), %s1598_s13, 3 }
   0x6   : > { %142 = sbr.rel (%p139_p2) target bundleno = 485 (0x1e5), region = 32  ;;  %p163_p3 = scmp.lt.s32.totalorder (!%p139_p2), %s1603_s14, 15 }
   0xb   : > { %v1665_v0 = vmov 0   ;;  %s2626_s14 = smov (!%p163_p3, %s1603_s14), 15  ;;  %v1666_v9 = vmov 1   ;;  %v174_v12 = vld [vmem:[%s2612_s1] sm:$0x3] }
   0xc   : > { %1651 = vset.pattern.permute.xlu2 %v1665_v0  ;;  %1650 = vset.pattern.permute.xlu1 %v1665_v0  ;;  %s1604_s15 = sshll.u32 %s2626_s14, 3  ;;  %v1717_v14 = vperm.slane %v174_v12, 0  ;;  %v1719_v15 = vperm.slane %v174_v12, 1  ;;  %v1724_v16 = vld [vmem:[%s2613_s2] ss:$0 sm:$0xff] }
   0xd   : > { %1649 = vset.pattern.permute.xlu0 %v1665_v0  ;;  %s166_s18 = scalar_lea.vmem %s2611_s0, %s1604_s15  ;;  %v1667_v48 = vmov 683565275   ;;  %v1668_v50 = vmov 2475754826   ;;  %v1669_v52 = vmov 2131351028   ;;  %s2019_s25 = scalar_lea.vmem %s2614_s3, %s1604_s15 }
   0xe   : > { %v180_v1 = vld [vmem:[%s166_s18 + $0x20] sm:$0xff]  ;;  %v178_v2 = vld [vmem:[%s166_s18 + $0x10] sm:$0xff]  ;;  %v181_v4 = vld [vmem:[%s166_s18 + $0x28] sm:$0xff]  ;;  %v1670_v54 = vmov 2102212464  }
   0xf   : > { %v176_v3 = vld [vmem:[%s166_s18] sm:$0xff]  ;;  %206 = vperm.xlu2 %1651, %v180_v1   ;;  %196 = vperm.xlu1 %1650, %v178_v2   ;;  %v179_v5 = vld [vmem:[%s166_s18 + $0x18] sm:$0xff]  ;;  %v177_v6 = vld [vmem:[%s166_s18 + $0x8] sm:$0xff]  ;;  %v1671_v56 = vmov 920167782  }
  0x10   : > { %186 = vperm.xlu0 %1649, %v176_v3   ;;  %v183_v7 = vld [vmem:[%s166_s18 + $0x38] sm:$0xff]  ;;  %v182_v8 = vld [vmem:[%s166_s18 + $0x30] sm:$0xff] }
  0x17   : > { %211 = vperm.xlu2 %1651, %v181_v4   ;;  %201 = vperm.xlu1 %1650, %v179_v5  }
  0x18   : > { %191 = vperm.xlu0 %1649, %v177_v6  }
  0x1f   : > { %1652 = vset.pattern.permute.xlu2 %v1666_v9  ;;  %221 = vperm.xlu1 %1650, %v183_v7  }
  0x20   : > { %216 = vperm.xlu0 %1649, %v182_v8   ;;  %245 = vperm.xlu2 %1652, %v176_v3  }
  0x27   : > { %1654 = vset.pattern.permute.xlu1 %v1666_v9 }
  0x28   : > { %1653 = vset.pattern.permute.xlu0 %v1666_v9  ;;  %253 = vperm.xlu1 %1654, %v178_v2   ;;  %v1672_v2 = vmov 1326507024  }
  0x29   : > { %257 = vperm.xlu2 %1652, %v179_v5   ;;  %249 = vperm.xlu0 %1653, %v177_v6  }
  0x30   : > { %261 = vperm.xlu1 %1654, %v180_v1  }
  0x31   : > { %265 = vperm.xlu2 %1652, %v181_v4   ;;  %269 = vperm.xlu0 %1653, %v182_v8  }
  0x38   : > { %273 = vperm.xlu1 %1654, %v183_v7  }
  0x69   : > { %v1712_v10 = vpop.permute.xlu2 %206 }
  0x71   : > { %v212_v11 = vpop.permute.xlu2 %211 }
  0x72   : > { %v230_v35 = vmul.f32 %v1717_v14, %v212_v11 }
  0x74   : > { %v241_v44 = vadd.f32 %v1724_v16, %v230_v35 }
  0x7a   : > { %v246_v13 = vpop.permute.xlu2 %245 }
  0x7b   : > { %v277_v19 = vmul.f32 %v1719_v15, %v246_v13 }
  0x81   : > { %v1726_v17 = vpop.permute.xlu1 %196 }
  0x82   : > { %v187_v18 = vpop.permute.xlu0 %186 }
  0x83   : > { %v225_v20 = vmul.f32 %v1717_v14, %v187_v18  ;;  %v258_v23 = vpop.permute.xlu2 %257 }
  0x84   : > { %v280_v27 = vmul.f32 %v1719_v15, %v258_v23 }
  0x85   : > { %v236_v21 = vadd.f32 %v1724_v16, %v225_v20 }
  0x87   : > { %v1731_v22 = vadd.f32 %v277_v19, %v236_v21 }
  0x89   : > { %v296_v24 = vand.u32 2139095040, %v1731_v22  ;;  %v202_v25 = vpop.permute.xlu1 %201  ;;  %v293_v26 = vand.u32 2147483647, %v1731_v22 }
  0x8a   : > { %v228_v28 = vmul.f32 %v1717_v14, %v202_v25 }
  0x8b   : > { %v297_v29 = vshrl.u32 %v296_v24, 23  ;;  %v300_v32 = vand.u32 8388607, %v293_v26  ;;  %v266_v37 = vpop.permute.xlu2 %265 }
  0x8c   : > { %v239_v30 = vadd.f32 %v1724_v16, %v228_v28  ;;  %v282_v46 = vmul.f32 %v1719_v15, %v266_v37 }
  0x8d   : > { %v1607_v31 = vadd.s32 4294967169, %v297_v29  ;;  %v301_v38 = vor.u32 8388608, %v300_v32 }
  0x8e   : > { %v1740_v33 = vadd.f32 %v280_v27, %v239_v30 }
  0x8f   : > { %v303_v34 = vadd.s32 1, %v1607_v31  ;;  %v1752_v58 = vshll.u32 %v301_v38, 8 }
  0x90   : > { %v761_v36 = vand.u32 2139095040, %v1740_v33  ;;  %v758_v40 = vand.u32 2147483647, %v1740_v33 }
  0x91   : > { %vm304_vm0 = vcmp.gt.s32.totalorder %v303_v34, 0  ;;  %v342_v11 = vand.u32 65535, %v1752_v58  ;;  %v343_v30 = vshrl.u32 %v1752_v58, 16 }
  0x92   : > { %v305_v39 = vsel %vm304_vm0, %v303_v34, 0  ;;  %v762_v41 = vshrl.u32 %v761_v36, 23  ;;  %v765_v59 = vand.u32 8388607, %v758_v40 }
  0x93   : > { %v306_v42 = vshrl.u32 %v305_v39, 5  ;;  %v307_v43 = vand.u32 31, %v305_v39  ;;  %v1774_v39 = vadd.f32 %v282_v46, %v241_v44 }
  0x94   : > { %v1616_v45 = vadd.s32 4294967169, %v762_v41  ;;  %v766_v21 = vor.u32 8388608, %v765_v59 }
  0x95   : > { %v308_v47 = vsub.s32 32, %v307_v43  ;;  %v310_v49 = vshll.u32 %v1667_v48, %v307_v43  ;;  %v313_v51 = vshll.u32 %v1668_v50, %v307_v43  ;;  %v316_v53 = vshll.u32 %v1669_v52, %v307_v43 }
  0x96   : > { %v319_v55 = vshll.u32 %v1670_v54, %v307_v43  ;;  %v322_v57 = vshll.u32 %v1671_v56, %v307_v43  ;;  %vm325_vm1 = vcmp.lt.s32.totalorder %v306_v42, 1  ;;  %vm328_vm2 = vcmp.lt.s32.totalorder %v306_v42, 4 }
  0x97   : > { %v311_v60 = vshrl.u32 %v1668_v50, %v308_v47  ;;  %v314_v61 = vshrl.u32 %v1669_v52, %v308_v47  ;;  %v317_v62 = vshrl.u32 %v1670_v54, %v308_v47  ;;  %v309_v63 = vshrl.u32 %v1667_v48, %v308_v47 }
  0x98   : > { %v320_v1 = vshrl.u32 %v1671_v56, %v308_v47  ;;  %v323_v3 = vshrl.u32 %v1672_v2, %v308_v47  ;;  %v768_v7 = vadd.s32 1, %v1616_v45  ;;  %vm327_vm3 = vcmp.lt.s32.totalorder %v306_v42, 3 }
  0x99   : > { %v312_v4 = vor.u32 %v311_v60, %v310_v49  ;;  %v315_v5 = vor.u32 %v314_v61, %v313_v51  ;;  %v318_v6 = vor.u32 %v317_v62, %v316_v53  ;;  %vm326_vm4 = vcmp.lt.s32.totalorder %v306_v42, 2 }
  0x9a   : > { %v321_v8 = vor.u32 %v320_v1, %v319_v55  ;;  %v324_v9 = vor.u32 %v323_v3, %v322_v57  ;;  %vm769_vm5 = vcmp.gt.s32.totalorder %v768_v7, 0  ;;  %v1772_v38 = vshll.u32 %v766_v21, 8 }
  0x9b   : > { %v330_v12 = vsel %vm328_vm2, %v318_v6, 2102212464  ;;  %v333_v13 = vsel %vm325_vm1, %v312_v4, %v315_v5  ;;  %v337_v18 = vsel %vm325_vm1, %v315_v5, %v318_v6  ;;  %v329_v23 = vsel %vm325_vm1, %v309_v63, %v312_v4 }
  0x9c   : > { %v334_v19 = vsel %vm328_vm2, %v321_v8, 920167782  ;;  %v338_v20 = vsel %vm328_vm2, %v324_v9, 1326507024  ;;  %v331_v24 = vsel %vm327_vm3, %v315_v5, %v330_v12  ;;  %v770_v31 = vsel %vm769_vm5, %v768_v7, 0 }
  0x9d   : > { %v335_v25 = vsel %vm327_vm3, %v318_v6, %v334_v19  ;;  %v339_v27 = vsel %vm327_vm3, %v321_v8, %v338_v20  ;;  %v1770_v37 = vsel %vm326_vm4, %v329_v23, %v331_v24  ;;  %v1776_v45 = vshrl.u32 %v770_v31, 5 }
  0x9e   : > { %v336_v28 = vsel %vm326_vm4, %v333_v13, %v335_v25  ;;  %v340_v29 = vsel %vm326_vm4, %v337_v18, %v339_v27  ;;  %v772_v47 = vand.u32 31, %v770_v31  ;;  %vm295_vm5 = vcmp.lt.s32.totalorder %v1731_v22, 0 }
  0x9f   : > { %v344_v32 = vand.u32 65535, %v340_v29  ;;  %v345_v34 = vshrl.u32 %v340_v29, 16  ;;  %v366_v35 = vand.u32 65535, %v336_v28  ;;  %v367_v36 = vshrl.u32 %v336_v28, 16 }
  0xa0   : > { %v1778_v3 = vsub.s32 32, %v772_v47  ;;  %v775_v9 = vshll.u32 %v1667_v48, %v772_v47  ;;  %v778_v13 = vshll.u32 %v1668_v50, %v772_v47  ;;  %v781_v24 = vshll.u32 %v1669_v52, %v772_v47 }
  0xa1   : > { %v347_v41 = vmul.u32 %v345_v34, %v342_v11  ;;  %v348_v43 = vmul.u32 %v344_v32, %v343_v30  ;;  %v346_v49 = vmul.u32 %v344_v32, %v342_v11  ;;  %v349_v51 = vmul.u32 %v345_v34, %v343_v30 }
  0xa2   : > { %v369_v53 = vmul.u32 %v367_v36, %v342_v11  ;;  %v370_v55 = vmul.u32 %v366_v35, %v343_v30  ;;  %v368_v60 = vmul.u32 %v366_v35, %v342_v11  ;;  %v371_v61 = vmul.u32 %v367_v36, %v343_v30 }
  0xa3   : > { %v350_v57 = vshll.u32 %v347_v41, 16  ;;  %v351_v59 = vshrl.u32 %v347_v41, 16  ;;  %v352_v42 = vshll.u32 %v348_v43, 16  ;;  %v353_v62 = vshrl.u32 %v348_v43, 16 }
  0xa4   : > { %v372_v63 = vshll.u32 %v369_v53, 16  ;;  %v373_v1 = vshrl.u32 %v369_v53, 16  ;;  %v374_v46 = vshll.u32 %v370_v55, 16  ;;  %v375_v5 = vshrl.u32 %v370_v55, 16 }
  0xa5   : > { %vm354_vm6 = vc.u32 %v346_v49, %v350_v57  ;;  %v356_v44 = vadd.s32 %v350_v57, %v346_v49  ;;  %v776_v20 = vshrl.u32 %v1668_v50, %v1778_v3  ;;  %v779_v21 = vshrl.u32 %v1669_v52, %v1778_v3 }
  0xa6   : > { %v355_v4 = vsel %vm354_vm6, 1, %v1665_v0  ;;  %vm376_vm7 = vc.u32 %v368_v60, %v372_v63  ;;  %v378_v6 = vadd.s32 %v372_v63, %v368_v60  ;;  %v782_v25 = vshrl.u32 %v1670_v54, %v1778_v3 }
  0xa7   : > { %v357_v7 = vadd.s32 %v355_v4, %v349_v51  ;;  %vm358_vm8 = vc.u32 %v356_v44, %v352_v42  ;;  %v377_v8 = vsel %vm376_vm7, 1, %v1665_v0  ;;  %v784_v27 = vshll.u32 %v1670_v54, %v772_v47 }
  0xa8   : > { %v359_v11 = vsel %vm358_vm8, 1, %v1665_v0  ;;  %v379_v12 = vadd.s32 %v377_v8, %v371_v61  ;;  %vm380_vm9 = vc.u32 %v378_v6, %v374_v46  ;;  %v1794_v29 = vor.u32 %v776_v20, %v775_v9 }
  0xa9   : > { %v361_v18 = vadd.s32 %v359_v11, %v357_v7  ;;  %v381_v19 = vsel %vm380_vm9, 1, %v1665_v0  ;;  %v1796_v30 = vor.u32 %v779_v21, %v778_v13  ;;  %v785_v31 = vshrl.u32 %v1671_v56, %v1778_v3 }
  0xaa   : > { %v383_v23 = vadd.s32 %v381_v19, %v379_v12  ;;  %v783_v34 = vor.u32 %v782_v25, %v781_v24  ;;  %v787_v35 = vshll.u32 %v1671_v56, %v772_v47  ;;  %v788_v36 = vshrl.u32 %v1672_v2, %v1778_v3 }
  0xab   : > { %v362_v28 = vadd.s32 %v361_v18, %v351_v59  ;;  %v1805_v43 = vadd.s32 %v378_v6, %v374_v46  ;;  %v786_v49 = vor.u32 %v785_v31, %v784_v27  ;;  %vm790_vm10 = vcmp.lt.s32.totalorder %v1776_v45, 1 }
  0xac   : > { %v384_v32 = vadd.s32 %v383_v23, %v373_v1  ;;  %v789_v53 = vor.u32 %v788_v36, %v787_v35  ;;  %vm793_vm11 = vcmp.lt.s32.totalorder %v1776_v45, 4  ;;  %v798_v55 = vsel %vm790_vm10, %v1794_v29, %v1796_v30 }
  0xad   : > { %v1803_v41 = vadd.s32 %v362_v28, %v353_v62  ;;  %vm792_vm13 = vcmp.lt.s32.totalorder %v1776_v45, 3  ;;  %v799_v47 = vsel %vm793_vm11, %v786_v49, 920167782  ;;  %v1071_v57 = vand.u32 2139095040, %v1774_v39 }
  0xae   : > { %v385_v51 = vadd.s32 %v384_v32, %v375_v5  ;;  %vm791_vm14 = vcmp.lt.s32.totalorder %v1776_v45, 2  ;;  %v800_v60 = vsel %vm792_vm13, %v783_v34, %v799_v47  ;;  %v802_v61 = vsel %vm790_vm10, %v1796_v30, %v783_v34 }
  0xaf   : > { %vm388_vm12 = vc.u32 %v1803_v41, %v1805_v43  ;;  %v386_v42 = vmul.u32 %v1752_v58, %v1770_v37  ;;  %v801_v62 = vsel %vm791_vm14, %v798_v55, %v800_v60  ;;  %v803_v63 = vsel %vm793_vm11, %v789_v53, 1326507024 }
  0xb0   : > { %v389_v59 = vadd.s32 1, %v385_v51  ;;  %v807_v1 = vand.u32 65535, %v1772_v38  ;;  %v804_v46 = vsel %vm792_vm13, %v786_v49, %v803_v63  ;;  %v831_v4 = vand.u32 65535, %v801_v62 }
  0xb1   : > { %v832_v5 = vshrl.u32 %v801_v62, 16  ;;  %v805_v7 = vsel %vm791_vm14, %v802_v61, %v804_v46  ;;  %v808_v58 = vshrl.u32 %v1772_v38, 16  ;;  %v1072_v37 = vshrl.u32 %v1071_v57, 23 }
  0xb2   : > { %v390_v44 = vsel %vm388_vm12, %v389_v59, %v385_v51  ;;  %v809_v8 = vand.u32 65535, %v805_v7  ;;  %v810_v9 = vshrl.u32 %v805_v7, 16  ;;  %v1068_v18 = vand.u32 2147483647, %v1774_v39 }
  0xb3   : > { %v391_v6 = vadd.s32 %v390_v44, %v386_v42  ;;  %v834_v11 = vmul.u32 %v832_v5, %v807_v1  ;;  %v835_v13 = vmul.u32 %v831_v4, %v808_v58  ;;  %v774_v19 = vshrl.u32 %v1667_v48, %v1778_v3 }
  0xb4   : > { %v795_v20 = vsel %vm793_vm11, %v783_v34, 2102212464  ;;  %v812_v21 = vmul.u32 %v810_v9, %v807_v1  ;;  %v813_v23 = vmul.u32 %v809_v8, %v808_v58  ;;  %v833_v25 = vmul.u32 %v831_v4, %v807_v1 }
  0xb5   : > { %v392_v12 = vadd.s32 536870912, %v391_v6  ;;  %v837_v27 = vshll.u32 %v834_v11, 16  ;;  %v1622_v28 = vadd.s32 4294967169, %v1072_v37  ;;  %v811_v31 = vmul.u32 %v809_v8, %v807_v1 }
  0xb6   : > { %v814_v32 = vmul.u32 %v810_v9, %v808_v58  ;;  %v815_v35 = vshll.u32 %v812_v21, 16  ;;  %v836_v36 = vmul.u32 %v832_v5, %v808_v58  ;;  %v817_v51 = vshll.u32 %v813_v23, 16 }
  0xb7   : > { %v393_v24 = vshrl.u32 %v392_v12, 30  ;;  %v839_v53 = vshll.u32 %v835_v13, 16  ;;  %vm841_vm15 = vc.u32 %v833_v25, %v837_v27  ;;  %v843_v47 = vadd.s32 %v837_v27, %v833_v25 }
  0xb8   : > { %vm819_vm0 = vc.u32 %v811_v31, %v815_v35  ;;  %v821_v55 = vadd.s32 %v815_v35, %v811_v31  ;;  %v842_v3 = vsel %vm841_vm15, 1, %v1665_v0  ;;  %v1075_v60 = vand.u32 8388607, %v1068_v18 }
  0xb9   : > { %v394_v49 = vshll.u32 %v393_v24, 30  ;;  %v820_v57 = vsel %vm819_vm0, 1, %v1665_v0  ;;  %v844_v59 = vadd.s32 %v842_v3, %v836_v36  ;;  %v794_v61 = vsel %vm790_vm10, %v774_v19, %v1794_v29 }
  0xba   : > { %v822_v42 = vadd.s32 %v820_v57, %v814_v32  ;;  %vm823_vm1 = vc.u32 %v821_v55, %v817_v51  ;;  %vm845_vm2 = vc.u32 %v843_v47, %v839_v53  ;;  %v796_v63 = vsel %vm792_vm13, %v1796_v30, %v795_v20  ;;  %v192_v32 = vpop.permute.xlu0 %191 }
  0xbb   : > { %v395_v34 = vsub.s32 %v391_v6, %v394_v49  ;;  %v824_v1 = vsel %vm823_vm1, 1, %v1665_v0  ;;  %v816_v44 = vshrl.u32 %v812_v21, 16  ;;  %v846_v4 = vsel %vm845_vm2, 1, %v1665_v0 }
  0xbc   : > { %v826_v46 = vadd.s32 %v824_v1, %v822_v42  ;;  %v1078_v5 = vadd.s32 1, %v1622_v28  ;;  %v818_v7 = vshrl.u32 %v813_v23, 16  ;;  %v838_v58 = vshrl.u32 %v834_v11, 16 }
  0xbd   : > { %vm396_vm3 = vcmp.lt.s32.totalorder %v395_v34, 0  ;;  %v397_v62 = vsub.s32 0, %v395_v34  ;;  %v848_v29 = vadd.s32 %v846_v4, %v844_v59  ;;  %v417_v8 = vsub.s32 4, %v393_v24 }
  0xbe   : > { %v827_v9 = vadd.s32 %v826_v46, %v816_v44  ;;  %vm1079_vm4 = vcmp.gt.s32.totalorder %v1078_v5, 0  ;;  %v840_v12 = vshrl.u32 %v835_v13, 16  ;;  %v1857_v21 = vadd.s32 %v843_v47, %v839_v53 }
  0xbf   : > { %v398_v6 = vsel %vm396_vm3, %v397_v62, %v395_v34  ;;  %v849_v19 = vadd.s32 %v848_v29, %v838_v58  ;;  %v1080_v25 = vsel %vm1079_vm4, %v1078_v5, 0  ;;  %v797_v27 = vsel %vm791_vm14, %v794_v61, %v796_v63 }
  0xc0   : > { %v399_v37 = vclz %v398_v6  ;;  %v1855_v20 = vadd.s32 %v827_v9, %v818_v7  ;;  %v1076_v11 = vor.u32 8388608, %v1075_v60  ;;  %v1082_v28 = vand.u32 31, %v1080_v25 }
  0xc1   : > { %v850_v23 = vadd.s32 %v849_v19, %v840_v12  ;;  %v227_v31 = vmul.f32 %v1717_v14, %v1726_v17  ;;  %v418_v13 = vsel %vm295_vm5, %v417_v8, %v393_v24  ;;  %vm1869_vm8 = vcmp.le.f32.partialorder %v293_v26, 0.7853982 }
  0xc2   : > { %v1608_v30 = vadd.s32 4294967294, %v399_v37  ;;  %vm853_vm7 = vc.u32 %v1855_v20, %v1857_v21  ;;  %v1873_v49 = vsub.s32 32, %v1082_v28  ;;  %v387_v17 = vadd.s32 %v1805_v43, %v1803_v41 }
  0xc3   : > { %v854_v36 = vadd.s32 1, %v850_v23  ;;  %v851_v24 = vmul.u32 %v1772_v38, %v797_v27  ;;  %v420_v55 = vsel %vm1869_vm8, 0, %v418_v13  ;;  %v226_v26 = vmul.f32 %v1717_v14, %v192_v32 }
  0xc4   : > { %vm1609_vm6 = vcmp.lt.s32.totalorder %v1608_v30, 0  ;;  %v1881_v47 = vshll.u32 %v1076_v11, 8  ;;  %v1086_v42 = vshrl.u32 %v1668_v50, %v1873_v49  ;;  %v1088_v41 = vshll.u32 %v1668_v50, %v1082_v28 }
  0xc5   : > { %v402_v45 = vsel %vm1609_vm6, 0, %v1608_v30  ;;  %v855_v3 = vsel %vm853_vm7, %v854_v36, %v850_v23  ;;  %v1089_v38 = vshrl.u32 %v1669_v52, %v1873_v49  ;;  %v1092_v43 = vshrl.u32 %v1670_v54, %v1873_v49 }
  0xc6   : > { %v403_v51 = vsub.s32 32, %v402_v45  ;;  %v407_v53 = vsub.s32 4294967266, %v402_v45  ;;  %v404_v57 = vshll.u32 %v395_v34, %v402_v45  ;;  %v856_v61 = vadd.s32 %v855_v3, %v851_v24 }
  0xc7   : > { %v1095_v34 = vshrl.u32 %v1671_v56, %v1873_v49  ;;  %v1091_v44 = vshll.u32 %v1669_v52, %v1082_v28  ;;  %v1094_v46 = vshll.u32 %v1670_v54, %v1082_v28  ;;  %v1097_v4 = vshll.u32 %v1671_v56, %v1082_v28 }
  0xc8   : > { %v405_v59 = vshrl.u32 %v387_v17, %v403_v51  ;;  %v408_v60 = vadd.s32 127, %v407_v53  ;;  %v857_v1 = vadd.s32 536870912, %v856_v61  ;;  %v1098_v5 = vshrl.u32 %v1672_v2, %v1873_v49 }
  0xc9   : > { %v1899_v58 = vshrl.u32 %v1080_v25, 5  ;;  %v1085_v29 = vshll.u32 %v1667_v48, %v1082_v28  ;;  %v1902_v37 = vor.u32 %v1089_v38, %v1088_v41  ;;  %v1093_v8 = vor.u32 %v1092_v43, %v1091_v44 }
  0xca   : > { %v406_v62 = vor.u32 %v405_v59, %v404_v57  ;;  %v409_v63 = vshll.u32 %v408_v60, 23  ;;  %v1897_v7 = vshrl.u32 %v857_v1, 30  ;;  %v1096_v9 = vor.u32 %v1095_v34, %v1094_v46 }
  0xcb   : > { %v1099_v12 = vor.u32 %v1098_v5, %v1097_v4  ;;  %v1906_v23 = vadd.f32 %v1724_v16, %v227_v31  ;;  %v437_v11 = vadd.s32 3, %v420_v55  ;;  %v1909_v13 = vadd.f32 %v1724_v16, %v226_v26 }
  0xcc   : > { %v410_v6 = vor.u32 4788187, %v409_v63  ;;  %v413_v30 = vcvt.s32.f32 %v406_v62  ;;  %v859_v27 = vshll.u32 %v1897_v7, 30  ;;  %v1911_v25 = vor.u32 %v1086_v42, %v1085_v29 }
  0xcd   : > { %vm1100_vm9 = vcmp.lt.s32.totalorder %v1899_v58, 1  ;;  %vm1103_vm10 = vcmp.lt.s32.totalorder %v1899_v58, 4  ;;  %v1925_v36 = vand.u32 65535, %v1881_v47  ;;  %vm1102_vm12 = vcmp.lt.s32.totalorder %v1899_v58, 3 }
  0xce   : > { %v411_v19 = vand.u32 2147483647, %v410_v6  ;;  %v1913_v28 = vsub.s32 %v856_v61, %v859_v27  ;;  %v1109_v45 = vsel %vm1103_vm10, %v1096_v9, 920167782  ;;  %v1112_v31 = vsel %vm1100_vm9, %v1902_v37, %v1093_v8 }
  0xcf   : > { %v1113_v16 = vsel %vm1103_vm10, %v1099_v12, 1326507024  ;;  %vm1101_vm13 = vcmp.lt.s32.totalorder %v1899_v58, 2  ;;  %v1108_v53 = vsel %vm1100_vm9, %v1911_v25, %v1902_v37  ;;  %v1938_v55 = vshrl.u32 %v1881_v47, 16  ;;  %v1977_v12 = vpop.permute.xlu0 %216 }
  0xd0   : > { %v414_v32 = vmul.f32 %v413_v30, %v411_v19  ;;  %vm861_vm11 = vcmp.lt.s32.totalorder %v1913_v28, 0  ;;  %v862_v51 = vsub.s32 0, %v1913_v28  ;;  %v1114_v24 = vsel %vm1102_vm12, %v1096_v9, %v1113_v16  ;;  %v1975_v9 = vpop.permute.xlu1 %221 }
  0xd1   : > { %v1110_v57 = vsel %vm1102_vm12, %v1093_v8, %v1109_v45  ;;  %v1115_v59 = vsel %vm1101_vm13, %v1112_v31, %v1114_v24  ;;  %v1954_v43 = vand.u32 3, %v437_v11  ;;  %v852_v62 = vadd.s32 %v1857_v21, %v1855_v20 }
  0xd2   : > { %v415_v17 = vxor.u32 2147483648, %v414_v32  ;;  %v863_v26 = vsel %vm861_vm11, %v862_v51, %v1913_v28  ;;  %v1119_v42 = vand.u32 65535, %v1115_v59  ;;  %v1120_v41 = vshrl.u32 %v1115_v59, 16 }
  0xd3   : > { %v864_v61 = vclz %v863_v26  ;;  %v882_v63 = vsub.s32 4, %v1897_v7  ;;  %vm760_vm14 = vcmp.lt.s32.totalorder %v1740_v33, 0  ;;  %v1111_v35 = vsel %vm1101_vm13, %v1108_v53, %v1110_v57 }
  0xd4   : > { %v416_v3 = vsel %vm295_vm5, %v415_v17, %v414_v32  ;;  %v1963_v34 = vmul.u32 %v1120_v41, %v1925_v36  ;;  %v1966_v44 = vmul.u32 %v1119_v42, %v1938_v55  ;;  %v1084_v5 = vshrl.u32 %v1667_v48, %v1873_v49 }
  0xd5   : > { %v1950_v60 = vsel %vm1869_vm8, %v1731_v22, %v416_v3  ;;  %v1617_v1 = vadd.s32 4294967294, %v864_v61  ;;  %v1105_v20 = vsel %vm1103_vm10, %v1093_v8, 2102212464  ;;  %v1121_v21 = vmul.u32 %v1119_v42, %v1925_v36 }
  0xd6   : > { %v421_v38 = vmul.f32 %v1950_v60, %v1950_v60  ;;  %v1124_v6 = vmul.u32 %v1120_v41, %v1938_v55  ;;  %v1125_v29 = vshll.u32 %v1963_v34, 16  ;;  %v1141_v11 = vand.u32 65535, %v1111_v35 }
  0xd7   : > { %vm1618_vm15 = vcmp.lt.s32.totalorder %v1617_v1, 0  ;;  %v1127_v45 = vshll.u32 %v1966_v44, 16  ;;  %v1142_v3 = vshrl.u32 %v1111_v35, 16  ;;  %vm1984_vm1 = vcmp.le.f32.partialorder %v758_v40, 0.7853982 }
  0xd8   : > { %v422_v46 = vmul.f32 -0.001358992, %v421_v38  ;;  %v429_v4 = vmul.f32 -0.00019511016, %v421_v38  ;;  %v867_v27 = vsel %vm1618_vm15, 0, %v1617_v1  ;;  %vm1129_vm0 = vc.u32 %v1121_v21, %v1125_v29 }
  0xd9   : > { %v868_v32 = vsub.s32 32, %v867_v27  ;;  %v872_v49 = vsub.s32 4294967266, %v867_v27  ;;  %v1130_v16 = vsel %vm1129_vm0, 1, %v1665_v0  ;;  %v1131_v17 = vadd.s32 %v1125_v29, %v1121_v21 }
  0xda   : > { %v423_v19 = vadd.f32 0.041655596, %v422_v46  ;;  %v430_v30 = vadd.f32 0.008332121, %v429_v4  ;;  %v869_v51 = vshll.u32 %v1913_v28, %v867_v27  ;;  %v1132_v61 = vadd.s32 %v1130_v16, %v1124_v6 }
  0xdb   : > { %v870_v53 = vshrl.u32 %v852_v62, %v868_v32  ;;  %v873_v24 = vadd.s32 127, %v872_v49  ;;  %vm1133_vm2 = vc.u32 %v1131_v17, %v1127_v45  ;;  %vm440_vm3 = vcmp.eq.s32.totalorder %v1954_v43, 0 }
  0xdc   : > { %v424_v8 = vmul.f32 %v423_v19, %v421_v38  ;;  %v431_v31 = vmul.f32 %v430_v30, %v421_v38  ;;  %vm443_vm4 = vcmp.eq.s32.totalorder %v1954_v43, 2  ;;  %v1134_v28 = vsel %vm1133_vm2, 1, %v1665_v0 }
  0xdd   : > { %v871_v42 = vor.u32 %v870_v53, %v869_v51  ;;  %v874_v41 = vshll.u32 %v873_v24, 23  ;;  %v1144_v62 = vmul.u32 %v1142_v3, %v1925_v36  ;;  %vm1533_vm5 = vcmask 261120  }
  0xde   : > { %v425_v26 = vadd.f32 -0.4999988, %v424_v8  ;;  %v432_v57 = vadd.f32 -0.16666654, %v431_v31  ;;  %vm439_vm6 = vcmp.lt.s32.totalorder %v1954_v43, 2  ;;  %v883_v40 = vsel %vm760_vm14, %v882_v63, %v1897_v7 }
  0xdf   : > { %v1104_v46 = vsel %vm1100_vm9, %v1084_v5, %v1911_v25  ;;  %vm436_vm7 = vweird.f32 %v1731_v22  ;;  %v875_v4 = vor.u32 4788187, %v874_v41  ;;  %v1143_v21 = vmul.u32 %v1141_v11, %v1925_v36  ;;  %v254_v25 = vpop.permute.xlu1 %253  ;;  %v250_v5 = vpop.permute.xlu0 %249 }
  0xe0   : > { %v426_v1 = vmul.f32 %v425_v26, %v421_v38  ;;  %v433_v35 = vmul.f32 %v432_v57, %v421_v38  ;;  %v1145_v6 = vmul.u32 %v1141_v11, %v1938_v55  ;;  %v1147_v29 = vshll.u32 %v1144_v62, 16 }
  0xe1   : > { %v1106_v30 = vsel %vm1102_vm12, %v1902_v37, %v1105_v20  ;;  %v1136_v27 = vadd.s32 %v1134_v28, %v1132_v61  ;;  %v876_v7 = vand.u32 2147483647, %v875_v4  ;;  %v878_v63 = vcvt.s32.f32 %v871_v42 }
  0xe2   : > { %v427_v19 = vadd.f32 1.0, %v426_v1  ;;  %v434_v38 = vadd.f32 1.0, %v433_v35  ;;  %v1146_v32 = vmul.u32 %v1142_v3, %v1938_v55  ;;  %vm1151_vm8 = vc.u32 %v1143_v21, %v1147_v29 }
  0xe3   : > { %v1126_v11 = vshrl.u32 %v1963_v34, 16  ;;  %v1152_v45 = vsel %vm1151_vm8, 1, %v1665_v0  ;;  %v879_v8 = vmul.f32 %v878_v63, %v876_v7  ;;  %v1149_v31 = vshll.u32 %v1145_v6, 16 }
  0xe4   : > { %v435_v49 = vmul.f32 %v434_v38, %v1950_v60  ;;  %v444_v36 = vxor.u32 2147483648, %v427_v19  ;;  %v1153_v16 = vadd.s32 %v1147_v29, %v1143_v21  ;;  %v1154_v37 = vadd.s32 %v1152_v45, %v1146_v32 }
  0xe5   : > { %v1137_v17 = vadd.s32 %v1136_v27, %v1126_v11  ;;  %v279_v51 = vmul.f32 %v1719_v15, %v254_v25  ;;  %v278_v55 = vmul.f32 %v1719_v15, %v250_v5  ;;  %v880_v53 = vxor.u32 2147483648, %v879_v8 }
  0xe6   : > { %v441_v20 = vxor.u32 2147483648, %v435_v49  ;;  %v885_v60 = vsel %vm1984_vm1, 0, %v883_v40  ;;  %v1128_v24 = vshrl.u32 %v1966_v44, 16  ;;  %vm1155_vm9 = vc.u32 %v1153_v16, %v1149_v31 }
  0xe7   : > { %v445_v3 = vsel %vm443_vm4, %v444_v36, %v435_v49  ;;  %v1156_v26 = vsel %vm1155_vm9, 1, %v1665_v0  ;;  %v2027_v57 = vadd.f32 %v279_v51, %v1906_v23  ;;  %v881_v61 = vsel %vm760_vm14, %v880_v53, %v879_v8 }
  0xe8   : > { %v442_v34 = vsel %vm440_vm3, %v427_v19, %v441_v20  ;;  %v1148_v42 = vshrl.u32 %v1144_v62, 16  ;;  %v1158_v41 = vadd.s32 %v1156_v26, %v1154_v37  ;;  %v884_v1 = vsel %vm1984_vm1, %v1740_v33, %v881_v61 }
  0xe9   : > { %v446_v44 = vsel %vm439_vm6, %v442_v34, %v445_v3  ;;  %v1138_v35 = vadd.s32 %v1137_v17, %v1128_v24  ;;  %v2039_v40 = vadd.f32 %v278_v55, %v1909_v13  ;;  %v886_v23 = vmul.f32 %v884_v1, %v884_v1 }
  0xea   : > { %v447_v28 = vsel %vm436_vm7, nan, %v446_v44  ;;  %v1150_v43 = vshrl.u32 %v1145_v6, 16  ;;  %v1159_v4 = vadd.s32 %v1158_v41, %v1148_v42  ;;  %v606_v21 = vand.u32 2139095040, %v2027_v57 }
  0xeb   : > { %1534 = vst.msk [vmem:[%s2019_s25] sm:$0xff] %vm1533_vm5, %v447_v28  ;;  %v1107_v62 = vsel %vm1101_vm13, %v1104_v46, %v1106_v30  ;;  %v1157_v22 = vadd.s32 %v1153_v16, %v1149_v31  ;;  %v603_v29 = vand.u32 2147483647, %v2027_v57  ;;  %v887_v19 = vmul.f32 -0.001358992, %v886_v23 }
  0xec   : > { %v894_v59 = vmul.f32 -0.00019511016, %v886_v23  ;;  %v1160_v38 = vadd.s32 %v1159_v4, %v1150_v43  ;;  %v607_v27 = vshrl.u32 %v606_v21, 23  ;;  %v902_v7 = vadd.s32 3, %v885_v60 }
  0xed   : > { %vm1163_vm10 = vc.u32 %v1138_v35, %v1157_v22  ;;  %v451_v13 = vand.u32 2139095040, %v2039_v40  ;;  %v888_v63 = vadd.f32 0.041655596, %v887_v19  ;;  %v1161_v5 = vmul.u32 %v1881_v47, %v1107_v62 }
  0xee   : > { %v895_v32 = vadd.f32 0.008332121, %v894_v59  ;;  %v1164_v6 = vadd.s32 1, %v1160_v38  ;;  %v1613_v25 = vadd.s32 4294967169, %v607_v27  ;;  %v610_v58 = vand.u32 8388607, %v603_v29 }
  0xef   : > { %v452_v46 = vshrl.u32 %v451_v13, 23  ;;  %v889_v30 = vmul.f32 %v888_v63, %v886_v23  ;;  %v903_v45 = vand.u32 3, %v902_v7  ;;  %vm1070_vm11 = vcmp.lt.s32.totalorder %v1774_v39, 0 }
  0xf0   : > { %v896_v49 = vmul.f32 %v895_v32, %v886_v23  ;;  %v1165_v36 = vsel %vm1163_vm10, %v1164_v6, %v1160_v38  ;;  %v613_v11 = vadd.s32 1, %v1613_v25  ;;  %v611_v20 = vor.u32 8388608, %v610_v58 }
  0xf1   : > { %v1166_v8 = vadd.s32 %v1165_v36, %v1161_v5  ;;  %v890_v31 = vadd.f32 -0.4999988, %v889_v30  ;;  %v448_v47 = vand.u32 2147483647, %v2039_v40  ;;  %v1610_v60 = vadd.s32 4294967169, %v452_v46 }
  0xf2   : > { %v897_v16 = vadd.f32 -0.16666654, %v896_v49  ;;  %vm614_vm12 = vcmp.gt.s32.totalorder %v613_v11, 0  ;;  %vm901_vm13 = vweird.f32 %v1740_v33  ;;  %vm904_vm14 = vcmp.lt.s32.totalorder %v903_v45, 2 }
  0xf3   : > { %v1167_v37 = vadd.s32 536870912, %v1166_v8  ;;  %v615_v17 = vsel %vm614_vm12, %v613_v11, 0  ;;  %v891_v51 = vmul.f32 %v890_v31, %v886_v23  ;;  %vm905_vm15 = vcmp.eq.s32.totalorder %v903_v45, 0 }
  0xf4   : > { %v898_v55 = vmul.f32 %v897_v16, %v886_v23  ;;  %v617_v53 = vand.u32 31, %v615_v17  ;;  %vm908_vm0 = vcmp.eq.s32.totalorder %v903_v45, 2  ;;  %v2054_v26 = vadd.s32 %v1157_v22, %v1138_v35 }
  0xf5   : > { %v1168_v24 = vshrl.u32 %v1167_v37, 30  ;;  %v892_v34 = vadd.f32 1.0, %v891_v51  ;;  %v2056_v41 = vshll.u32 %v611_v20, 8  ;;  %v2060_v28 = vand.u32 8388607, %v448_v47 }
  0xf6   : > { %v899_v3 = vadd.f32 1.0, %v898_v55  ;;  %v618_v44 = vsub.s32 32, %v617_v53  ;;  %vm2064_vm1 = vcmp.le.f32.partialorder %v1068_v18, 0.7853982  ;;  %v458_v21 = vadd.s32 1, %v1610_v60 }
  0xf7   : > { %v1169_v61 = vshll.u32 %v1168_v24, 30  ;;  %v1192_v42 = vsub.s32 4, %v1168_v24  ;;  %v909_v43 = vxor.u32 2147483648, %v892_v34  ;;  %v2071_v22 = vshrl.u32 %v615_v17, 5 }
  0xf8   : > { %v900_v23 = vmul.f32 %v899_v3, %v884_v1  ;;  %v621_v35 = vshrl.u32 %v1668_v50, %v618_v44  ;;  %v620_v19 = vshll.u32 %v1667_v48, %v617_v53  ;;  %v624_v59 = vshrl.u32 %v1669_v52, %v618_v44 }
  0xf9   : > { %v2069_v62 = vsub.s32 %v1166_v8, %v1169_v61  ;;  %v1193_v1 = vsel %vm1070_vm11, %v1192_v42, %v1168_v24  ;;  %v623_v18 = vshll.u32 %v1668_v50, %v617_v53  ;;  %v626_v27 = vshll.u32 %v1669_v52, %v617_v53 }
  0xfa   : > { %v906_v38 = vxor.u32 2147483648, %v900_v23  ;;  %v910_v7 = vsel %vm908_vm0, %v909_v43, %v900_v23  ;;  %v627_v63 = vshrl.u32 %v1670_v54, %v618_v44  ;;  %v622_v6 = vor.u32 %v621_v35, %v620_v19 }
  0xfb   : > { %vm1171_vm2 = vcmp.lt.s32.totalorder %v2069_v62, 0  ;;  %v1172_v13 = vsub.s32 0, %v2069_v62  ;;  %v629_v25 = vshll.u32 %v1670_v54, %v617_v53  ;;  %v630_v5 = vshrl.u32 %v1671_v56, %v618_v44 }
  0xfc   : > { %v907_v32 = vsel %vm905_vm15, %v892_v34, %v906_v38  ;;  %v625_v30 = vor.u32 %v624_v59, %v623_v18  ;;  %v632_v49 = vshll.u32 %v1671_v56, %v617_v53  ;;  %v633_v31 = vshrl.u32 %v1672_v2, %v618_v44 }
  0xfd   : > { %v911_v58 = vsel %vm904_vm14, %v907_v32, %v910_v7  ;;  %v1173_v46 = vsel %vm1171_vm2, %v1172_v13, %v2069_v62  ;;  %v631_v8 = vor.u32 %v630_v5, %v629_v25  ;;  %v628_v16 = vor.u32 %v627_v63, %v626_v27 }
  0xfe   : > { %v912_v36 = vsel %vm901_vm13, nan, %v911_v58  ;;  %v1174_v11 = vclz %v1173_v46  ;;  %v652_v37 = vand.u32 65535, %v2056_v41  ;;  %v653_v45 = vshrl.u32 %v2056_v41, 16 }
  0xff   : > { %1537 = vst.msk [vmem:[%s2019_s25 + $0x18] sm:$0xff] %vm1533_vm5, %v912_v36  ;;  %v456_v20 = vor.u32 8388608, %v2060_v28  ;;  %v619_v51 = vshrl.u32 %v1667_v48, %v618_v44  ;;  %v634_v55 = vor.u32 %v633_v31, %v632_v49  ;;  %vm459_vm3 = vcmp.gt.s32.totalorder %v458_v21, 0 }
 0x100   : > { %v1623_v17 = vadd.s32 4294967294, %v1174_v11  ;;  %v1195_v33 = vsel %vm2064_vm1, 0, %v1193_v1  ;;  %vm635_vm4 = vcmp.lt.s32.totalorder %v2071_v22, 1  ;;  %vm636_vm6 = vcmp.lt.s32.totalorder %v2071_v22, 2 }
 0x101   : > { %vm638_vm7 = vcmp.lt.s32.totalorder %v2071_v22, 4  ;;  %vm637_vm9 = vcmp.lt.s32.totalorder %v2071_v22, 3  ;;  %v643_v53 = vsel %vm635_vm4, %v622_v6, %v625_v30  ;;  %v647_v3 = vsel %vm635_vm4, %v625_v30, %v628_v16 }
 0x102   : > { %vm1624_vm8 = vcmp.lt.s32.totalorder %v1623_v17, 0  ;;  %v644_v60 = vsel %vm638_vm7, %v631_v8, 920167782  ;;  %v648_v44 = vsel %vm638_vm7, %v634_v55, 1326507024  ;;  %v639_v28 = vsel %vm635_vm4, %v619_v51, %v622_v6 }
 0x103   : > { %v1177_v24 = vsel %vm1624_vm8, 0, %v1623_v17  ;;  %v645_v34 = vsel %vm637_vm9, %v628_v16, %v644_v60  ;;  %v640_v23 = vsel %vm638_vm7, %v628_v16, 2102212464  ;;  %v649_v19 = vsel %vm637_vm9, %v631_v8, %v648_v44 }
 0x104   : > { %v1178_v61 = vsub.s32 32, %v1177_v24  ;;  %v1182_v42 = vsub.s32 4294967266, %v1177_v24  ;;  %v1179_v43 = vshll.u32 %v2069_v62, %v1177_v24  ;;  %v646_v35 = vsel %vm636_vm6, %v643_v53, %v645_v34 }
 0x105   : > { %v460_v59 = vsel %vm459_vm3, %v458_v21, 0  ;;  %v650_v18 = vsel %vm636_vm6, %v647_v3, %v649_v19  ;;  %v676_v27 = vand.u32 65535, %v646_v35  ;;  %v641_v7 = vsel %vm637_vm9, %v625_v30, %v640_v23 }
 0x106   : > { %v1180_v38 = vshrl.u32 %v2054_v26, %v1178_v61  ;;  %v1183_v1 = vadd.s32 127, %v1182_v42  ;;  %v654_v13 = vand.u32 65535, %v650_v18  ;;  %v655_v62 = vshrl.u32 %v650_v18, 16 }
 0x107   : > { %v677_v63 = vshrl.u32 %v646_v35, 16  ;;  %v2119_v32 = vmul.f32 %v1717_v14, %v1712_v10  ;;  %v2121_v21 = vshll.u32 %v456_v20, 8  ;;  %v2123_v26 = vadd.s32 3, %v1195_v33 }
 0x108   : > { %v1181_v6 = vor.u32 %v1180_v38, %v1179_v43  ;;  %v1184_v25 = vshll.u32 %v1183_v1, 23  ;;  %v657_v5 = vmul.u32 %v655_v62, %v652_v37  ;;  %v658_v58 = vmul.u32 %v654_v13, %v653_v45 }
 0x109   : > { %v680_v46 = vmul.u32 %v676_v27, %v653_v45  ;;  %v2127_v30 = vsel %vm636_vm6, %v639_v28, %v641_v7  ;;  %v679_v36 = vmul.u32 %v677_v63, %v652_v37  ;;  %v462_v11 = vand.u32 31, %v460_v59 }
 0x10a   : > { %v1185_v49 = vor.u32 4788187, %v1184_v25  ;;  %v656_v8 = vmul.u32 %v654_v13, %v652_v37  ;;  %v659_v31 = vmul.u32 %v655_v62, %v653_v45  ;;  %v660_v10 = vshll.u32 %v657_v5, 16 }
 0x10b   : > { %v678_v16 = vmul.u32 %v676_v27, %v652_v37  ;;  %v1188_v51 = vcvt.s32.f32 %v1181_v6  ;;  %v681_v20 = vmul.u32 %v677_v63, %v653_v45  ;;  %v682_v55 = vshll.u32 %v679_v36, 16 }
 0x10c   : > { %v1186_v17 = vand.u32 2147483647, %v1185_v49  ;;  %v662_v33 = vshll.u32 %v658_v58, 16  ;;  %vm664_vm10 = vc.u32 %v656_v8, %v660_v10  ;;  %v666_v53 = vadd.s32 %v660_v10, %v656_v8 }
 0x10d   : > { %v684_v60 = vshll.u32 %v680_v46, 16  ;;  %v665_v34 = vsel %vm664_vm10, 1, %v1665_v0  ;;  %vm686_vm12 = vc.u32 %v678_v16, %v682_v55  ;;  %v688_v22 = vadd.s32 %v682_v55, %v678_v16 }
 0x10e   : > { %v1189_v24 = vmul.f32 %v1188_v51, %v1186_v17  ;;  %v667_v3 = vadd.s32 %v665_v34, %v659_v31  ;;  %vm668_vm13 = vc.u32 %v666_v53, %v662_v33  ;;  %v687_v44 = vsel %vm686_vm12, 1, %v1665_v0 }
 0x10f   : > { %v2131_v61 = vsub.s32 32, %v462_v11  ;;  %v669_v42 = vsel %vm668_vm13, 1, %v1665_v0  ;;  %v689_v45 = vadd.s32 %v687_v44, %v681_v20  ;;  %vm690_vm14 = vc.u32 %v688_v22, %v684_v60 }
 0x110   : > { %v1190_v37 = vxor.u32 2147483648, %v1189_v24  ;;  %v661_v28 = vshrl.u32 %v657_v5, 16  ;;  %v671_v23 = vadd.s32 %v669_v42, %v667_v3  ;;  %v691_v43 = vsel %vm690_vm14, 1, %v1665_v0 }
 0x111   : > { %v2135_v35 = vshrl.u32 %v460_v59, 5  ;;  %v663_v38 = vshrl.u32 %v658_v58, 16  ;;  %v683_v1 = vshrl.u32 %v679_v36, 16  ;;  %v693_v18 = vadd.s32 %v691_v43, %v689_v45 }
 0x112   : > { %v1191_v19 = vsel %vm1070_vm11, %v1190_v37, %v1189_v24  ;;  %v672_v7 = vadd.s32 %v671_v23, %v661_v28  ;;  %v685_v13 = vshrl.u32 %v680_v46, 16  ;;  %v2142_v62 = vadd.s32 %v688_v22, %v684_v60 }
 0x113   : > { %v1194_v27 = vsel %vm2064_vm1, %v1774_v39, %v1191_v19  ;;  %v694_v6 = vadd.s32 %v693_v18, %v683_v1  ;;  %v466_v59 = vshrl.u32 %v1668_v50, %v2131_v61  ;;  %v469_v25 = vshrl.u32 %v1669_v52, %v2131_v61 }
 0x114   : > { %v1196_v63 = vmul.f32 %v1194_v27, %v1194_v27  ;;  %v2148_v5 = vadd.s32 %v672_v7, %v663_v38  ;;  %v472_v58 = vshrl.u32 %v1670_v54, %v2131_v61  ;;  %v474_v4 = vshll.u32 %v1670_v54, %v462_v11 }
 0x115   : > { %v475_v46 = vshrl.u32 %v1671_v56, %v2131_v61  ;;  %v695_v8 = vadd.s32 %v694_v6, %v685_v13  ;;  %v468_v31 = vshll.u32 %v1668_v50, %v462_v11  ;;  %v471_v10 = vshll.u32 %v1669_v52, %v462_v11 }
 0x116   : > { %v1197_v49 = vmul.f32 -0.001358992, %v1196_v63  ;;  %v1204_v36 = vmul.f32 -0.00019511016, %v1196_v63  ;;  %vm698_vm11 = vc.u32 %v2148_v5, %v2142_v62  ;;  %v477_v17 = vshll.u32 %v1671_v56, %v462_v11 }
 0x117   : > { %v476_v16 = vor.u32 %v475_v46, %v474_v4  ;;  %v699_v55 = vadd.s32 1, %v695_v8  ;;  %v478_v33 = vshrl.u32 %v1672_v2, %v2131_v61  ;;  %v696_v53 = vmul.u32 %v2056_v41, %v2127_v30  ;;  %v2176_v41 = vld [vmem:[%s2613_s2] ss:$0 sm:$0xff] }
 0x118   : > { %v1198_v51 = vadd.f32 0.041655596, %v1197_v49  ;;  %v1205_v20 = vadd.f32 0.008332121, %v1204_v36  ;;  %v465_v60 = vshll.u32 %v1667_v48, %v462_v11  ;;  %v2165_v24 = vor.u32 %v469_v25, %v468_v31 }
 0x119   : > { %v2167_v34 = vor.u32 %v472_v58, %v471_v10  ;;  %v700_v44 = vsel %vm698_vm11, %v699_v55, %v695_v8  ;;  %v479_v37 = vor.u32 %v478_v33, %v477_v17  ;;  %vm480_vm15 = vcmp.lt.s32.totalorder %v2135_v35, 1 }
 0x11a   : > { %v1199_v22 = vmul.f32 %v1198_v51, %v1196_v63  ;;  %v1206_v3 = vmul.f32 %v1205_v20, %v1196_v63  ;;  %v701_v42 = vadd.s32 %v700_v44, %v696_v53  ;;  %v2169_v45 = vor.u32 %v466_v59, %v465_v60 }
 0x11b   : > { %vm483_vm0 = vcmp.lt.s32.totalorder %v2135_v35, 4  ;;  %v2180_v30 = vadd.f32 %v2176_v41, %v2119_v32  ;;  %v1213_v43 = vand.u32 3, %v2123_v26  ;;  %vm481_vm1 = vcmp.lt.s32.totalorder %v2135_v35, 2 }
 0x11c   : > { %v1200_v11 = vadd.f32 -0.4999988, %v1199_v22  ;;  %v1207_v28 = vadd.f32 -0.16666654, %v1206_v3  ;;  %v489_v23 = vsel %vm483_vm0, %v476_v16, 920167782  ;;  %v492_v38 = vsel %vm480_vm15, %v2165_v24, %v2167_v34 }
 0x11d   : > { %v702_v19 = vadd.s32 536870912, %v701_v42  ;;  %vm482_vm2 = vcmp.lt.s32.totalorder %v2135_v35, 3  ;;  %v493_v32 = vsel %vm483_vm0, %v479_v37, 1326507024  ;;  %v488_v26 = vsel %vm480_vm15, %v2169_v45, %v2165_v24 }
 0x11e   : > { %v1201_v1 = vmul.f32 %v1200_v11, %v1196_v63  ;;  %v1208_v18 = vmul.f32 %v1207_v28, %v1196_v63  ;;  %v490_v13 = vsel %vm482_vm2, %v2167_v34, %v489_v23  ;;  %v494_v6 = vsel %vm482_vm2, %v476_v16, %v493_v32 }
 0x11f   : > { %v2193_v7 = vshrl.u32 %v702_v19, 30  ;;  %vm1211_vm3 = vweird.f32 %v1774_v39  ;;  %v495_v25 = vsel %vm481_vm1, %v492_v38, %v494_v6  ;;  %v497_v4 = vand.u32 65535, %v2121_v21 }
 0x120   : > { %v1202_v63 = vadd.f32 1.0, %v1201_v1  ;;  %v1209_v59 = vadd.f32 1.0, %v1208_v18  ;;  %v499_v46 = vand.u32 65535, %v495_v25  ;;  %v500_v49 = vshrl.u32 %v495_v25, 16 }
 0x121   : > { %v704_v58 = vshll.u32 %v2193_v7, 30  ;;  %v491_v31 = vsel %vm481_vm1, %v488_v26, %v490_v13  ;;  %v498_v10 = vshrl.u32 %v2121_v21, 16  ;;  %vm1214_vm4 = vcmp.lt.s32.totalorder %v1213_v43, 2 }
 0x122   : > { %v1210_v36 = vmul.f32 %v1209_v59, %v1194_v27  ;;  %v1219_v8 = vxor.u32 2147483648, %v1202_v63  ;;  %v231_v16 = vmul.f32 %v1717_v14, %v1977_v12  ;;  %v502_v51 = vmul.u32 %v500_v49, %v497_v4 }
 0x123   : > { %v705_v17 = vsub.s32 %v701_v42, %v704_v58  ;;  %vm1215_vm6 = vcmp.eq.s32.totalorder %v1213_v43, 0  ;;  %vm1218_vm7 = vcmp.eq.s32.totalorder %v1213_v43, 2  ;;  %v2214_v55 = vmul.u32 %v499_v46, %v498_v10  ;;  %v262_v58 = vpop.permute.xlu1 %261 }
 0x124   : > { %v1216_v20 = vxor.u32 2147483648, %v1210_v36  ;;  %v521_v33 = vand.u32 65535, %v491_v31  ;;  %v522_v53 = vshrl.u32 %v491_v31, 16  ;;  %v1220_v22 = vsel %vm1218_vm7, %v1219_v8, %v1210_v36 }
 0x125   : > { %vm706_vm8 = vcmp.lt.s32.totalorder %v705_v17, 0  ;;  %v707_v27 = vsub.s32 0, %v705_v17  ;;  %v501_v3 = vmul.u32 %v499_v46, %v497_v4  ;;  %v505_v44 = vshll.u32 %v502_v51, 16  ;;  %v270_v46 = vpop.permute.xlu0 %269 }
 0x126   : > { %v1217_v60 = vsel %vm1215_vm6, %v1202_v63, %v1216_v20  ;;  %v504_v12 = vmul.u32 %v500_v49, %v498_v10  ;;  %v507_v42 = vshll.u32 %v2214_v55, 16  ;;  %v242_v38 = vadd.f32 %v2176_v41, %v231_v16 }
 0x127   : > { %v1221_v37 = vsel %vm1214_vm4, %v1217_v60, %v1220_v22  ;;  %v708_v11 = vsel %vm706_vm8, %v707_v27, %v705_v17  ;;  %vm509_vm9 = vc.u32 %v501_v3, %v505_v44  ;;  %v511_v19 = vadd.s32 %v505_v44, %v501_v3 }
 0x128   : > { %v1222_v28 = vsel %vm1211_vm3, nan, %v1221_v37  ;;  %v709_v23 = vclz %v708_v11  ;;  %v464_v1 = vshrl.u32 %v1667_v48, %v2131_v61  ;;  %v485_v43 = vsel %vm483_vm0, %v2167_v34, 2102212464 }
 0x129   : > { %1539 = vst.msk [vmem:[%s2019_s25 + $0x28] sm:$0xff] %vm1533_vm5, %v1222_v28  ;;  %v510_v18 = vsel %vm509_vm9, 1, %v1665_v0  ;;  %vm513_vm10 = vc.u32 %v511_v19, %v507_v42  ;;  %v524_v39 = vmul.u32 %v522_v53, %v497_v4  ;;  %v697_v13 = vadd.s32 %v2142_v62, %v2148_v5 }
 0x12a   : > { %v1614_v32 = vadd.s32 4294967294, %v709_v23  ;;  %v512_v26 = vadd.s32 %v510_v18, %v504_v12  ;;  %v484_v6 = vsel %vm480_vm15, %v464_v1, %v2169_v45  ;;  %v514_v63 = vsel %vm513_vm10, 1, %v1665_v0 }
 0x12b   : > { %v525_v61 = vmul.u32 %v521_v33, %v498_v10  ;;  %v486_v34 = vsel %vm482_vm2, %v2165_v24, %v485_v43  ;;  %v527_v25 = vshll.u32 %v524_v39, 16  ;;  %v506_v36 = vshrl.u32 %v502_v51, 16 }
 0x12c   : > { %vm1615_vm12 = vcmp.lt.s32.totalorder %v1614_v32, 0  ;;  %v516_v59 = vadd.s32 %v514_v63, %v512_v26  ;;  %v523_v8 = vmul.u32 %v521_v33, %v497_v4  ;;  %v526_v62 = vmul.u32 %v522_v53, %v498_v10 }
 0x12d   : > { %v712_v49 = vsel %vm1615_vm12, 0, %v1614_v32  ;;  %v529_v45 = vshll.u32 %v525_v61, 16  ;;  %v281_v27 = vmul.f32 %v1719_v15, %v262_v58  ;;  %v283_v60 = vmul.f32 %v1719_v15, %v270_v46 }
 0x12e   : > { %v713_v5 = vsub.s32 32, %v712_v49  ;;  %v714_v31 = vshll.u32 %v705_v17, %v712_v49  ;;  %v717_v16 = vsub.s32 4294967266, %v712_v49  ;;  %vm531_vm13 = vc.u32 %v523_v8, %v527_v25 }
 0x12f   : > { %v533_v20 = vadd.s32 %v527_v25, %v523_v8  ;;  %v517_v3 = vadd.s32 %v516_v59, %v506_v36  ;;  %v532_v44 = vsel %vm531_vm13, 1, %v1665_v0  ;;  %v727_v37 = vsub.s32 4, %v2193_v7 }
 0x130   : > { %v715_v22 = vshrl.u32 %v697_v13, %v713_v5  ;;  %v718_v24 = vadd.s32 127, %v717_v16  ;;  %v534_v51 = vadd.s32 %v532_v44, %v526_v62  ;;  %v2243_v4 = vadd.f32 %v281_v27, %v2180_v30 }
 0x131   : > { %vm535_vm14 = vc.u32 %v533_v20, %v529_v45  ;;  %v508_v33 = vshrl.u32 %v2214_v55, 16  ;;  %v528_v11 = vshrl.u32 %v524_v39, 16  ;;  %v2248_v28 = vadd.f32 %v283_v60, %v242_v38 }
 0x132   : > { %v716_v10 = vor.u32 %v715_v22, %v714_v31  ;;  %v719_v17 = vshll.u32 %v718_v24, 23  ;;  %v536_v53 = vsel %vm535_vm14, 1, %v1665_v0  ;;  %v913_v42 = vand.u32 2147483647, %v2243_v4 }
 0x133   : > { %v538_v12 = vadd.s32 %v536_v53, %v534_v51  ;;  %v518_v19 = vadd.s32 %v517_v3, %v508_v33  ;;  %v916_v1 = vand.u32 2139095040, %v2243_v4  ;;  %vm605_vm11 = vcmp.lt.s32.totalorder %v2027_v57, 0 }
 0x134   : > { %v720_v23 = vor.u32 4788187, %v719_v17  ;;  %v487_v30 = vsel %vm481_vm1, %v484_v6, %v486_v34  ;;  %v530_v43 = vshrl.u32 %v525_v61, 16  ;;  %v723_v32 = vcvt.s32.f32 %v716_v10 }
 0x135   : > { %v539_v18 = vadd.s32 %v538_v12, %v528_v11  ;;  %v537_v26 = vadd.s32 %v533_v20, %v529_v45  ;;  %v917_v39 = vshrl.u32 %v916_v1, 23  ;;  %v728_v38 = vsel %vm605_vm11, %v727_v37, %v2193_v7 }
 0x136   : > { %v721_v55 = vand.u32 2147483647, %v720_v23  ;;  %v920_v63 = vand.u32 8388607, %v913_v42  ;;  %v1226_v59 = vand.u32 2139095040, %v2248_v28  ;;  %v541_v58 = vmul.u32 %v2121_v21, %v487_v30 }
 0x137   : > { %v540_v13 = vadd.s32 %v539_v18, %v530_v43  ;;  %vm543_vm15 = vc.u32 %v518_v19, %v537_v26  ;;  %v1619_v35 = vadd.s32 4294967169, %v917_v39  ;;  %vm604_vm0 = vcmp.le.f32.partialorder %v603_v29, 0.7853982 }
 0x138   : > { %v724_v25 = vmul.f32 %v723_v32, %v721_v55  ;;  %v730_v34 = vsel %vm604_vm0, 0, %v728_v38  ;;  %v921_v7 = vor.u32 8388608, %v920_v63  ;;  %v1227_v36 = vshrl.u32 %v1226_v59, 23 }
 0x139   : > { %v544_v6 = vadd.s32 1, %v540_v13  ;;  %v923_v46 = vadd.s32 1, %v1619_v35  ;;  %v747_v31 = vadd.s32 3, %v730_v34  ;;  %v1223_v29 = vand.u32 2147483647, %v2248_v28 }
 0x13a   : > { %v725_v61 = vxor.u32 2147483648, %v724_v25  ;;  %v2267_v60 = vshll.u32 %v921_v7, 8  ;;  %v1625_v21 = vadd.s32 4294967169, %v1227_v36  ;;  %v2271_v22 = vmul.f32 %v1717_v14, %v1975_v9 }
 0x13b   : > { %v545_v49 = vsel %vm543_vm15, %v544_v6, %v540_v13  ;;  %vm924_vm1 = vcmp.gt.s32.totalorder %v923_v46, 0  ;;  %v2273_v37 = vand.u32 3, %v747_v31  ;;  %vm450_vm2 = vcmp.lt.s32.totalorder %v2039_v40, 0 }
 0x13c   : > { %v726_v8 = vsel %vm605_vm11, %v725_v61, %v724_v25  ;;  %v546_v62 = vadd.s32 %v545_v49, %v541_v58  ;;  %v925_v16 = vsel %vm924_vm1, %v923_v46, 0  ;;  %v2278_v10 = vand.u32 8388607, %v1223_v29 }
 0x13d   : > { %v729_v5 = vsel %vm604_vm0, %v2027_v57, %v726_v8  ;;  %v927_v27 = vand.u32 31, %v925_v16  ;;  %vm2282_vm3 = vcmp.le.f32.partialorder %v448_v47, 0.7853982  ;;  %v2286_v14 = vadd.s32 %v537_v26, %v518_v19 }
 0x13e   : > { %v731_v45 = vmul.f32 %v729_v5, %v729_v5  ;;  %v547_v20 = vadd.s32 536870912, %v546_v62  ;;  %v2289_v12 = vand.u32 65535, %v2267_v60  ;;  %v2292_v23 = vshrl.u32 %v2267_v60, 16 }
 0x13f   : > { %v928_v51 = vsub.s32 32, %v927_v27  ;;  %v2294_v1 = vadd.s32 1, %v1625_v21  ;;  %v2298_v47 = vshrl.u32 %v925_v16, 5  ;;  %v930_v55 = vshll.u32 %v1667_v48, %v927_v27 }
 0x140   : > { %v732_v24 = vmul.f32 -0.001358992, %v731_v45  ;;  %v739_v3 = vmul.f32 -0.00019511016, %v731_v45  ;;  %v548_v44 = vshrl.u32 %v547_v20, 30  ;;  %v933_v32 = vshll.u32 %v1668_v50, %v927_v27 }
 0x141   : > { %v931_v19 = vshrl.u32 %v1668_v50, %v928_v51  ;;  %v934_v26 = vshrl.u32 %v1669_v52, %v928_v51  ;;  %vm753_vm4 = vcmp.eq.s32.totalorder %v2273_v37, 2  ;;  %vm750_vm7 = vcmp.eq.s32.totalorder %v2273_v37, 0 }
 0x142   : > { %v733_v17 = vadd.f32 0.041655596, %v732_v24  ;;  %v740_v33 = vadd.f32 0.008332121, %v739_v3  ;;  %v549_v9 = vshll.u32 %v548_v44, 30  ;;  %v572_v11 = vsub.s32 4, %v548_v44 }
 0x143   : > { %v937_v59 = vshrl.u32 %v1670_v54, %v928_v51  ;;  %v939_v25 = vshll.u32 %v1670_v54, %v927_v27  ;;  %v940_v35 = vshrl.u32 %v1671_v56, %v928_v51  ;;  %vm749_vm8 = vcmp.lt.s32.totalorder %v2273_v37, 2 }
 0x144   : > { %v734_v30 = vmul.f32 %v733_v17, %v731_v45  ;;  %v741_v43 = vmul.f32 %v740_v33, %v731_v45  ;;  %v2296_v18 = vsub.s32 %v546_v62, %v549_v9  ;;  %v573_v63 = vsel %vm450_vm2, %v572_v11, %v548_v44 }
 0x145   : > { %v943_v58 = vshrl.u32 %v1672_v2, %v928_v51  ;;  %vm746_vm9 = vweird.f32 %v2027_v57  ;;  %v932_v49 = vor.u32 %v931_v19, %v930_v55  ;;  %v936_v7 = vshll.u32 %v1669_v52, %v927_v27 }
 0x146   : > { %v735_v39 = vadd.f32 -0.4999988, %v734_v30  ;;  %v742_v38 = vadd.f32 -0.16666654, %v741_v43  ;;  %vm551_vm6 = vcmp.lt.s32.totalorder %v2296_v18, 0  ;;  %v552_v13 = vsub.s32 0, %v2296_v18 }
 0x147   : > { %v941_v36 = vor.u32 %v940_v35, %v939_v25  ;;  %v935_v31 = vor.u32 %v934_v26, %v933_v32  ;;  %v942_v16 = vshll.u32 %v1671_v56, %v927_v27  ;;  %v929_v21 = vshrl.u32 %v1667_v48, %v928_v51 }
 0x148   : > { %v736_v6 = vmul.f32 %v735_v39, %v731_v45  ;;  %v743_v61 = vmul.f32 %v742_v38, %v731_v45  ;;  %v553_v34 = vsel %vm551_vm6, %v552_v13, %v2296_v18  ;;  %v575_v45 = vsel %vm2282_vm3, 0, %v573_v63 }
 0x149   : > { %v554_v46 = vclz %v553_v34  ;;  %v938_v24 = vor.u32 %v937_v59, %v936_v7  ;;  %v944_v17 = vor.u32 %v943_v58, %v942_v16  ;;  %vm948_vm10 = vcmp.lt.s32.totalorder %v2298_v47, 4 }
 0x14a   : > { %v737_v8 = vadd.f32 1.0, %v736_v6  ;;  %v744_v62 = vadd.f32 1.0, %v743_v61  ;;  %vm945_vm13 = vcmp.lt.s32.totalorder %v2298_v47, 1  ;;  %vm946_vm14 = vcmp.lt.s32.totalorder %v2298_v47, 2 }
 0x14b   : > { %v1611_v20 = vadd.s32 4294967294, %v554_v46  ;;  %v954_v27 = vsel %vm948_vm10, %v941_v36, 920167782  ;;  %vm947_vm11 = vcmp.lt.s32.totalorder %v2298_v47, 3  ;;  %v953_v51 = vsel %vm945_vm13, %v932_v49, %v935_v31 }
 0x14c   : > { %v745_v3 = vmul.f32 %v744_v62, %v729_v5  ;;  %v754_v44 = vxor.u32 2147483648, %v737_v8  ;;  %v955_v19 = vsel %vm947_vm11, %v938_v24, %v954_v27  ;;  %v957_v32 = vsel %vm945_vm13, %v935_v31, %v938_v24 }
 0x14d   : > { %vm1612_vm12 = vcmp.lt.s32.totalorder %v1611_v20, 0  ;;  %v958_v26 = vsel %vm948_vm10, %v944_v17, 1326507024  ;;  %v950_v37 = vsel %vm948_vm10, %v938_v24, 2102212464  ;;  %vm1234_vm15 = vcmp.gt.s32.totalorder %v2294_v1, 0 }
 0x14e   : > { %v751_v33 = vxor.u32 2147483648, %v745_v3  ;;  %v557_v9 = vsel %vm1612_vm12, 0, %v1611_v20  ;;  %v755_v5 = vsel %vm753_vm4, %v754_v44, %v745_v3  ;;  %v959_v59 = vsel %vm947_vm11, %v941_v36, %v958_v26 }
 0x14f   : > { %v558_v11 = vsub.s32 32, %v557_v9  ;;  %v559_v30 = vshll.u32 %v2296_v18, %v557_v9  ;;  %v562_v43 = vsub.s32 4294967266, %v557_v9  ;;  %v956_v18 = vsel %vm946_vm14, %v953_v51, %v955_v19 }
 0x150   : > { %v752_v55 = vsel %vm750_vm7, %v737_v8, %v751_v33  ;;  %v986_v25 = vand.u32 65535, %v956_v18  ;;  %v987_v35 = vshrl.u32 %v956_v18, 16  ;;  %v592_v7 = vadd.s32 3, %v575_v45 }
 0x151   : > { %v756_v39 = vsel %vm749_vm8, %v752_v55, %v755_v5  ;;  %v560_v38 = vshrl.u32 %v2286_v14, %v558_v11  ;;  %v563_v13 = vadd.s32 127, %v562_v43  ;;  %v960_v14 = vsel %vm946_vm14, %v957_v32, %v959_v59 }
 0x152   : > { %v757_v63 = vsel %vm746_vm9, nan, %v756_v39  ;;  %v964_v34 = vand.u32 65535, %v960_v14  ;;  %v965_v58 = vshrl.u32 %v960_v14, 16  ;;  %v989_v57 = vmul.u32 %v987_v35, %v2289_v12 }
 0x153   : > { %1536 = vst.msk [vmem:[%s2019_s25 + $0x10] sm:$0xff] %vm1533_vm5, %v757_v63  ;;  %v561_v6 = vor.u32 %v560_v38, %v559_v30  ;;  %v564_v61 = vshll.u32 %v563_v13, 23  ;;  %v949_v36 = vsel %vm945_vm13, %v929_v21, %v932_v49  ;;  %v990_v8 = vmul.u32 %v986_v25, %v2292_v23 }
 0x154   : > { %v951_v62 = vsel %vm947_vm11, %v935_v31, %v950_v37  ;;  %v967_v16 = vmul.u32 %v965_v58, %v2289_v12  ;;  %v968_v20 = vmul.u32 %v964_v34, %v2292_v23  ;;  %v988_v24 = vmul.u32 %v986_v25, %v2289_v12 }
 0x155   : > { %v565_v46 = vor.u32 4788187, %v564_v61  ;;  %v568_v44 = vcvt.s32.f32 %v561_v6  ;;  %v991_v17 = vmul.u32 %v987_v35, %v2292_v23  ;;  %v992_v27 = vshll.u32 %v989_v57, 16 }
 0x156   : > { %v966_v45 = vmul.u32 %v964_v34, %v2289_v12  ;;  %v969_v49 = vmul.u32 %v965_v58, %v2292_v23  ;;  %v970_v21 = vshll.u32 %v967_v16, 16  ;;  %v994_v33 = vshll.u32 %v990_v8, 16 }
 0x157   : > { %v566_v3 = vand.u32 2147483647, %v565_v46  ;;  %v972_v51 = vshll.u32 %v968_v20, 16  ;;  %vm996_vm0 = vc.u32 %v988_v24, %v992_v27  ;;  %v998_v31 = vadd.s32 %v992_v27, %v988_v24 }
 0x158   : > { %vm974_vm1 = vc.u32 %v966_v45, %v970_v21  ;;  %v976_v5 = vadd.s32 %v970_v21, %v966_v45  ;;  %v997_v11 = vsel %vm996_vm0, 1, %v1665_v0  ;;  %v1235_v30 = vsel %vm1234_vm15, %v2294_v1, 0 }
 0x159   : > { %v569_v9 = vmul.f32 %v568_v44, %v566_v3  ;;  %v975_v55 = vsel %vm974_vm1, 1, %v1665_v0  ;;  %v999_v12 = vadd.s32 %v997_v11, %v991_v17  ;;  %vm1000_vm4 = vc.u32 %v998_v31, %v994_v33 }
 0x15a   : > { %v952_v23 = vsel %vm946_vm14, %v949_v36, %v951_v62  ;;  %v977_v19 = vadd.s32 %v975_v55, %v969_v49  ;;  %vm978_vm6 = vc.u32 %v976_v5, %v972_v51  ;;  %v1001_v32 = vsel %vm1000_vm4, 1, %v1665_v0 }
 0x15b   : > { %v570_v43 = vxor.u32 2147483648, %v569_v9  ;;  %v979_v39 = vsel %vm978_vm6, 1, %v1665_v0  ;;  %v993_v38 = vshrl.u32 %v989_v57, 16  ;;  %v1003_v13 = vadd.s32 %v1001_v32, %v999_v12 }
 0x15c   : > { %v971_v18 = vshrl.u32 %v967_v16, 16  ;;  %v981_v63 = vadd.s32 %v979_v39, %v977_v19  ;;  %v1237_v59 = vand.u32 31, %v1235_v30  ;;  %v995_v25 = vshrl.u32 %v990_v8, 16 }
 0x15d   : > { %v571_v26 = vsel %vm450_vm2, %v570_v43, %v569_v9  ;;  %v1004_v35 = vadd.s32 %v1003_v13, %v993_v38  ;;  %v1231_v6 = vor.u32 8388608, %v2278_v10  ;;  %v2384_v61 = vand.u32 3, %v592_v7 }
 0x15e   : > { %v574_v1 = vsel %vm2282_vm3, %v2039_v40, %v571_v26  ;;  %v973_v37 = vshrl.u32 %v968_v20, 16  ;;  %v982_v14 = vadd.s32 %v981_v63, %v971_v18  ;;  %v2386_v34 = vsub.s32 32, %v1237_v59 }
 0x15f   : > { %v576_v47 = vmul.f32 %v574_v1, %v574_v1  ;;  %v1005_v46 = vadd.s32 %v1004_v35, %v995_v25  ;;  %v1006_v53 = vmul.u32 %v2267_v60, %v952_v23  ;;  %v2391_v62 = vadd.s32 %v998_v31, %v994_v33 }
 0x160   : > { %v2389_v36 = vadd.s32 %v982_v14, %v973_v37  ;;  %v2393_v16 = vshrl.u32 %v1235_v30, 5  ;;  %v1241_v10 = vshrl.u32 %v1668_v50, %v2386_v34  ;;  %v1240_v24 = vshll.u32 %v1667_v48, %v1237_v59 }
 0x161   : > { %v577_v58 = vmul.f32 -0.001358992, %v576_v47  ;;  %v584_v57 = vmul.f32 -0.00019511016, %v576_v47  ;;  %v1009_v20 = vadd.s32 1, %v1005_v46  ;;  %v1243_v3 = vshll.u32 %v1668_v50, %v1237_v59 }
 0x162   : > { %vm1008_vm2 = vc.u32 %v2389_v36, %v2391_v62  ;;  %v1244_v60 = vshrl.u32 %v1669_v52, %v2386_v34  ;;  %v1247_v44 = vshrl.u32 %v1670_v54, %v2386_v34  ;;  %v1246_v49 = vshll.u32 %v1669_v52, %v1237_v59 }
 0x163   : > { %v578_v7 = vadd.f32 0.041655596, %v577_v58  ;;  %v585_v8 = vadd.f32 0.008332121, %v584_v57  ;;  %v1010_v45 = vsel %vm1008_vm2, %v1009_v20, %v1005_v46  ;;  %v2406_v33 = vor.u32 %v1241_v10, %v1240_v24 }
 0x164   : > { %v1011_v21 = vadd.s32 %v1010_v45, %v1006_v53  ;;  %v1249_v9 = vshll.u32 %v1670_v54, %v1237_v59  ;;  %v1250_v51 = vshrl.u32 %v1671_v56, %v2386_v34  ;;  %v1252_v11 = vshll.u32 %v1671_v56, %v1237_v59 }
 0x165   : > { %v579_v17 = vmul.f32 %v578_v7, %v576_v47  ;;  %v586_v27 = vmul.f32 %v585_v8, %v576_v47  ;;  %v1253_v30 = vshrl.u32 %v1672_v2, %v2386_v34  ;;  %v2414_v55 = vor.u32 %v1244_v60, %v1243_v3 }
 0x166   : > { %v1012_v43 = vadd.s32 536870912, %v1011_v21  ;;  %v2416_v12 = vor.u32 %v1247_v44, %v1246_v49  ;;  %v1251_v23 = vor.u32 %v1250_v51, %v1249_v9  ;;  %vm1258_vm3 = vcmp.lt.s32.totalorder %v2393_v16, 4 }
 0x167   : > { %v580_v31 = vadd.f32 -0.4999988, %v579_v17  ;;  %v587_v5 = vadd.f32 -0.16666654, %v586_v27  ;;  %v1254_v26 = vor.u32 %v1253_v30, %v1252_v11  ;;  %vm591_vm7 = vweird.f32 %v2039_v40 }
 0x168   : > { %v2420_v39 = vshrl.u32 %v1012_v43, 30  ;;  %v1264_v38 = vsel %vm1258_vm3, %v1251_v23, 920167782  ;;  %v2424_v13 = vshll.u32 %v1231_v6, 8  ;;  %vm1255_vm8 = vcmp.lt.s32.totalorder %v2393_v16, 1 }
 0x169   : > { %v581_v19 = vmul.f32 %v580_v31, %v576_v47  ;;  %v588_v32 = vmul.f32 %v587_v5, %v576_v47  ;;  %vm1257_vm9 = vcmp.lt.s32.totalorder %v2393_v16, 3  ;;  %v1263_v47 = vsel %vm1255_vm8, %v2406_v33, %v2414_v55 }
 0x16a   : > { %v1014_v59 = vshll.u32 %v2420_v39, 30  ;;  %v1265_v25 = vsel %vm1257_vm9, %v2416_v12, %v1264_v38  ;;  %v1267_v35 = vsel %vm1255_vm8, %v2414_v55, %v2416_v12  ;;  %vm594_vm10 = vcmp.lt.s32.totalorder %v2384_v61, 2 }
 0x16b   : > { %v582_v18 = vadd.f32 1.0, %v581_v19  ;;  %v589_v63 = vadd.f32 1.0, %v588_v32  ;;  %v1268_v14 = vsel %vm1258_vm3, %v1254_v26, 1326507024  ;;  %vm595_vm12 = vcmp.eq.s32.totalorder %v2384_v61, 0 }
 0x16c   : > { %v1015_v58 = vsub.s32 %v1011_v21, %v1014_v59  ;;  %vm1256_vm13 = vcmp.lt.s32.totalorder %v2393_v16, 2  ;;  %v1269_v57 = vsel %vm1257_vm9, %v1251_v23, %v1268_v14  ;;  %vm598_vm14 = vcmp.eq.s32.totalorder %v2384_v61, 2 }
 0x16d   : > { %v590_v6 = vmul.f32 %v589_v63, %v574_v1  ;;  %v599_v37 = vxor.u32 2147483648, %v582_v18  ;;  %v1266_v1 = vsel %vm1256_vm13, %v1263_v47, %v1265_v25  ;;  %v1270_v53 = vsel %vm1256_vm13, %v1267_v35, %v1269_v57 }
 0x16e   : > { %vm1016_vm11 = vcmp.lt.s32.totalorder %v1015_v58, 0  ;;  %v1017_v10 = vsub.s32 0, %v1015_v58  ;;  %v1272_v7 = vand.u32 65535, %v2424_v13  ;;  %v1274_v8 = vand.u32 65535, %v1270_v53 }
 0x16f   : > { %v596_v46 = vxor.u32 2147483648, %v590_v6  ;;  %v600_v24 = vsel %vm598_vm14, %v599_v37, %v590_v6  ;;  %v1273_v3 = vshrl.u32 %v2424_v13, 16  ;;  %v1275_v60 = vshrl.u32 %v1270_v53, 16 }
 0x170   : > { %v1018_v17 = vsel %vm1016_vm11, %v1017_v10, %v1015_v58  ;;  %v1296_v27 = vand.u32 65535, %v1266_v1  ;;  %v1297_v45 = vshrl.u32 %v1266_v1, 16  ;;  %v243_v31 = vadd.f32 %v2176_v41, %v2271_v22 }
 0x171   : > { %v597_v20 = vsel %vm595_vm12, %v582_v18, %v596_v46  ;;  %v1019_v21 = vclz %v1018_v17  ;;  %v1277_v9 = vmul.u32 %v1275_v60, %v1272_v7  ;;  %v1278_v51 = vmul.u32 %v1274_v8, %v1273_v3 }
 0x172   : > { %v601_v44 = vsel %vm594_vm10, %v597_v20, %v600_v24  ;;  %v1239_v11 = vshrl.u32 %v1667_v48, %v2386_v34  ;;  %v1276_v61 = vmul.u32 %v1274_v8, %v1272_v7  ;;  %v1007_v43 = vadd.s32 %v2391_v62, %v2389_v36  ;;  %v274_v36 = vpop.permute.xlu1 %273 }
 0x173   : > { %v602_v49 = vsel %vm591_vm7, nan, %v601_v44  ;;  %v1620_v5 = vadd.s32 4294967294, %v1019_v21  ;;  %v1280_v30 = vshll.u32 %v1277_v9, 16  ;;  %v1279_v23 = vmul.u32 %v1275_v60, %v1273_v3 }
 0x174   : > { %1535 = vst.msk [vmem:[%s2019_s25 + $0x8] sm:$0xff] %vm1533_vm5, %v602_v49  ;;  %v1282_v40 = vshll.u32 %v1278_v51, 16  ;;  %v1299_v19 = vmul.u32 %v1297_v45, %v1272_v7  ;;  %v1298_v26 = vmul.u32 %v1296_v27, %v1272_v7  ;;  %v1300_v22 = vmul.u32 %v1296_v27, %v1273_v3 }
 0x175   : > { %vm1621_vm15 = vcmp.lt.s32.totalorder %v1620_v5, 0  ;;  %vm1284_vm0 = vc.u32 %v1276_v61, %v1280_v30  ;;  %v1286_v32 = vadd.s32 %v1280_v30, %v1276_v61  ;;  %v1281_v34 = vshrl.u32 %v1277_v9, 16 }
 0x176   : > { %v1022_v38 = vsel %vm1621_vm15, 0, %v1620_v5  ;;  %v1285_v41 = vsel %vm1284_vm0, 1, %v1665_v0  ;;  %v1302_v18 = vshll.u32 %v1299_v19, 16  ;;  %v1301_v35 = vmul.u32 %v1297_v45, %v1273_v3 }
 0x177   : > { %v1023_v63 = vsub.s32 32, %v1022_v38  ;;  %v1027_v59 = vsub.s32 4294967266, %v1022_v38  ;;  %v1287_v47 = vadd.s32 %v1285_v41, %v1279_v23  ;;  %v1024_v25 = vshll.u32 %v1015_v58, %v1022_v38 }
 0x178   : > { %vm1288_vm1 = vc.u32 %v1286_v32, %v1282_v40  ;;  %vm1306_vm4 = vc.u32 %v1298_v26, %v1302_v18  ;;  %v1304_v46 = vshll.u32 %v1300_v22, 16  ;;  %v1308_v1 = vadd.s32 %v1302_v18, %v1298_v26 }
 0x179   : > { %v1025_v62 = vshrl.u32 %v1007_v43, %v1023_v63  ;;  %v1028_v6 = vadd.s32 127, %v1027_v59  ;;  %v1289_v37 = vsel %vm1288_vm1, 1, %v1665_v0  ;;  %v1307_v14 = vsel %vm1306_vm4, 1, %v1665_v0 }
 0x17a   : > { %v1291_v57 = vadd.s32 %v1289_v37, %v1287_v47  ;;  %v1309_v53 = vadd.s32 %v1307_v14, %v1301_v35  ;;  %v1260_v58 = vsel %vm1258_vm3, %v2416_v12, 2102212464  ;;  %v284_v8 = vmul.f32 %v1719_v15, %v274_v36 }
 0x17b   : > { %v1026_v10 = vor.u32 %v1025_v62, %v1024_v25  ;;  %v1029_v7 = vshll.u32 %v1028_v6, 23  ;;  %v1259_v20 = vsel %vm1255_vm8, %v1239_v11, %v2406_v33  ;;  %vm1310_vm6 = vc.u32 %v1308_v1, %v1304_v46 }
 0x17c   : > { %v1292_v24 = vadd.s32 %v1291_v57, %v1281_v34  ;;  %v1283_v60 = vshrl.u32 %v1278_v51, 16  ;;  %v1311_v44 = vsel %vm1310_vm6, 1, %v1665_v0  ;;  %v2477_v17 = vadd.f32 %v284_v8, %v243_v31 }
 0x17d   : > { %v1030_v3 = vor.u32 4788187, %v1029_v7  ;;  %v1037_v27 = vsub.s32 4, %v2420_v39  ;;  %v1261_v12 = vsel %vm1257_vm9, %v2414_v55, %v1260_v58  ;;  %v1303_v45 = vshrl.u32 %v1299_v19, 16 }
 0x17e   : > { %v1313_v15 = vadd.s32 %v1311_v44, %v1309_v53  ;;  %v1033_v21 = vcvt.s32.f32 %v1026_v10  ;;  %v2483_v9 = vadd.s32 %v1292_v24, %v1283_v60  ;;  %v1381_v33 = vand.u32 2139095040, %v2477_v17 }
 0x17f   : > { %v1031_v49 = vand.u32 2147483647, %v1030_v3  ;;  %v1305_v5 = vshrl.u32 %v1300_v22, 16  ;;  %vm915_vm2 = vcmp.lt.s32.totalorder %v2243_v4, 0  ;;  %v2487_v11 = vadd.s32 %v1308_v1, %v1304_v46 }
 0x180   : > { %v1314_v51 = vadd.s32 %v1313_v15, %v1303_v45  ;;  %v1382_v61 = vshrl.u32 %v1381_v33, 23  ;;  %v1038_v30 = vsel %vm915_vm2, %v1037_v27, %v2420_v39  ;;  %v1262_v55 = vsel %vm1256_vm13, %v1259_v20, %v1261_v12 }
 0x181   : > { %v1034_v31 = vmul.f32 %v1033_v21, %v1031_v49  ;;  %vm1318_vm3 = vc.u32 %v2483_v9, %v2487_v11  ;;  %vm914_vm7 = vcmp.le.f32.partialorder %v913_v42, 0.7853982  ;;  %v1316_v38 = vmul.u32 %v2424_v13, %v1262_v55 }
 0x182   : > { %v1315_v43 = vadd.s32 %v1314_v51, %v1305_v5  ;;  %v1628_v40 = vadd.s32 4294967169, %v1382_v61  ;;  %v1040_v26 = vsel %vm914_vm7, 0, %v1038_v30  ;;  %v1378_v16 = vand.u32 2147483647, %v2477_v17 }
 0x183   : > { %v1035_v23 = vxor.u32 2147483648, %v1034_v31  ;;  %v1057_v59 = vadd.s32 3, %v1040_v26  ;;  %vm1056_vm13 = vweird.f32 %v2243_v4  ;;  %vm1225_vm6 = vcmp.lt.s32.totalorder %v2248_v28, 0 }
 0x184   : > { %v1319_v19 = vadd.s32 1, %v1315_v43  ;;  %v1388_v41 = vadd.s32 1, %v1628_v40  ;;  %v1385_v42 = vand.u32 8388607, %v1378_v16  ;;  %v1317_v40 = vadd.s32 %v2487_v11, %v2483_v9 }
 0x185   : > { %v1036_v32 = vsel %vm915_vm2, %v1035_v23, %v1034_v31  ;;  %v1058_v37 = vand.u32 3, %v1057_v59  ;;  %vm2566_vm2 = vcmp.le.f32.partialorder %v1223_v29, 0.7853982 }
 0x186   : > { %v1039_v39 = vsel %vm914_vm7, %v2243_v4, %v1036_v32  ;;  %v1320_v22 = vsel %vm1318_vm3, %v1319_v19, %v1315_v43  ;;  %vm1389_vm8 = vcmp.gt.s32.totalorder %v1388_v41, 0  ;;  %v1386_v53 = vor.u32 8388608, %v1385_v42 }
 0x187   : > { %v1041_v18 = vmul.f32 %v1039_v39, %v1039_v39  ;;  %v1321_v63 = vadd.s32 %v1320_v22, %v1316_v38  ;;  %v1390_v34 = vsel %vm1389_vm8, %v1388_v41, 0  ;;  %vm1060_vm9 = vcmp.eq.s32.totalorder %v1058_v37, 0 }
 0x188   : > { %v1392_v36 = vand.u32 31, %v1390_v34  ;;  %v2506_v8 = vshrl.u32 %v1390_v34, 5  ;;  %vm1059_vm10 = vcmp.lt.s32.totalorder %v1058_v37, 2  ;;  %vm1063_vm14 = vcmp.eq.s32.totalorder %v1058_v37, 2 }
 0x189   : > { %v1042_v47 = vmul.f32 -0.001358992, %v1041_v18  ;;  %v1049_v25 = vmul.f32 -0.00019511016, %v1041_v18  ;;  %v1322_v35 = vadd.s32 536870912, %v1321_v63  ;;  %v2530_v32 = vshll.u32 %v1386_v53, 8 }
 0x18a   : > { %v2503_v14 = vsub.s32 32, %v1392_v36  ;;  %v1395_v20 = vshll.u32 %v1667_v48, %v1392_v36  ;;  %v1398_v45 = vshll.u32 %v1668_v50, %v1392_v36  ;;  %v1401_v15 = vshll.u32 %v1669_v52, %v1392_v36 }
 0x18b   : > { %v1043_v62 = vadd.f32 0.041655596, %v1042_v47  ;;  %v1050_v13 = vadd.f32 0.008332121, %v1049_v25  ;;  %v2501_v6 = vshrl.u32 %v1322_v35, 30  ;;  %v1404_v49 = vshll.u32 %v1670_v54, %v1392_v36 }
 0x18c   : > { %v1396_v24 = vshrl.u32 %v1668_v50, %v2503_v14  ;;  %v1399_v3 = vshrl.u32 %v1669_v52, %v2503_v14  ;;  %v1402_v60 = vshrl.u32 %v1670_v54, %v2503_v14  ;;  %v1405_v21 = vshrl.u32 %v1671_v56, %v2503_v14 }
 0x18d   : > { %v1044_v57 = vmul.f32 %v1043_v62, %v1041_v18  ;;  %v1051_v46 = vmul.f32 %v1050_v13, %v1041_v18  ;;  %v1324_v1 = vshll.u32 %v2501_v6, 30  ;;  %v1408_v31 = vshrl.u32 %v1672_v2, %v2503_v14 }
 0x18e   : > { %v2523_v30 = vor.u32 %v1396_v24, %v1395_v20  ;;  %v2525_v55 = vor.u32 %v1399_v3, %v1398_v45  ;;  %v1406_v43 = vor.u32 %v1405_v21, %v1404_v49  ;;  %v1403_v52 = vor.u32 %v1402_v60, %v1401_v15 }
 0x18f   : > { %v1045_v10 = vadd.f32 -0.4999988, %v1044_v57  ;;  %v1052_v7 = vadd.f32 -0.16666654, %v1051_v46  ;;  %v1325_v58 = vsub.s32 %v1321_v63, %v1324_v1  ;;  %v1407_v54 = vshll.u32 %v1671_v56, %v1392_v36 }
 0x190   : > { %vm1410_vm11 = vcmp.lt.s32.totalorder %v2506_v8, 1  ;;  %vm1413_vm15 = vcmp.lt.s32.totalorder %v2506_v8, 4  ;;  %vm1412_vm1 = vcmp.lt.s32.totalorder %v2506_v8, 3  ;;  %vm1411_vm4 = vcmp.lt.s32.totalorder %v2506_v8, 2 }
 0x191   : > { %v1046_v44 = vmul.f32 %v1045_v10, %v1041_v18  ;;  %v1053_v27 = vmul.f32 %v1052_v7, %v1041_v18  ;;  %vm1326_vm12 = vcmp.lt.s32.totalorder %v1325_v58, 0  ;;  %v1327_v12 = vsub.s32 0, %v1325_v58 }
 0x192   : > { %v1409_v2 = vor.u32 %v1408_v31, %v1407_v54  ;;  %v1418_v56 = vsel %vm1410_vm11, %v2523_v30, %v2525_v55  ;;  %v1419_v9 = vsel %vm1413_vm15, %v1406_v43, 920167782  ;;  %v1422_v25 = vsel %vm1410_vm11, %v2525_v55, %v1403_v52 }
 0x193   : > { %v1047_v33 = vadd.f32 1.0, %v1046_v44  ;;  %v1054_v5 = vadd.f32 1.0, %v1053_v27  ;;  %v1328_v51 = vsel %vm1326_vm12, %v1327_v12, %v1325_v58  ;;  %v1427_v13 = vand.u32 65535, %v2530_v32 }
 0x194   : > { %v1329_v61 = vclz %v1328_v51  ;;  %v1423_v36 = vsel %vm1413_vm15, %v1409_v2, 1326507024  ;;  %v1428_v53 = vshrl.u32 %v2530_v32, 16  ;;  %v1347_v3 = vsub.s32 4, %v2501_v6 }
 0x195   : > { %v1055_v50 = vmul.f32 %v1054_v5, %v1039_v39  ;;  %v1064_v23 = vxor.u32 2147483648, %v1047_v33  ;;  %v1420_v39 = vsel %vm1412_vm1, %v1403_v52, %v1419_v9  ;;  %v1424_v4 = vsel %vm1412_vm1, %v1406_v43, %v1423_v36 }
 0x196   : > { %v1626_v19 = vadd.s32 4294967294, %v1329_v61  ;;  %v1421_v47 = vsel %vm1411_vm4, %v1418_v56, %v1420_v39  ;;  %v1425_v1 = vsel %vm1411_vm4, %v1422_v25, %v1424_v4  ;;  %v1394_v44 = vshrl.u32 %v1667_v48, %v2503_v14 }
 0x197   : > { %v1061_v26 = vxor.u32 2147483648, %v1055_v50  ;;  %v1065_v38 = vsel %vm1063_vm14, %v1064_v23, %v1055_v50  ;;  %v1451_v62 = vand.u32 65535, %v1421_v47  ;;  %v1452_v37 = vshrl.u32 %v1421_v47, 16 }
 0x198   : > { %vm1627_vm0 = vcmp.lt.s32.totalorder %v1626_v19, 0  ;;  %v1429_v10 = vand.u32 65535, %v1425_v1  ;;  %v1430_v7 = vshrl.u32 %v1425_v1, 16  ;;  %v1415_v27 = vsel %vm1413_vm15, %v1403_v52, 2102212464 }
 0x199   : > { %v1062_v11 = vsel %vm1060_vm9, %v1047_v33, %v1061_v26  ;;  %v1332_v41 = vsel %vm1627_vm0, 0, %v1626_v19  ;;  %v1455_v60 = vmul.u32 %v1451_v62, %v1428_v53  ;;  %v1453_v21 = vmul.u32 %v1451_v62, %v1427_v13 }
 0x19a   : > { %v1066_v22 = vsel %vm1059_vm10, %v1062_v11, %v1065_v38  ;;  %v1333_v18 = vsub.s32 32, %v1332_v41  ;;  %v1337_v63 = vsub.s32 4294967266, %v1332_v41  ;;  %v1334_v34 = vshll.u32 %v1325_v58, %v1332_v41 }
 0x19b   : > { %v1067_v59 = vsel %vm1056_vm13, nan, %v1066_v22  ;;  %v1454_v58 = vmul.u32 %v1452_v37, %v1427_v13  ;;  %v1432_v12 = vmul.u32 %v1430_v7, %v1427_v13  ;;  %v1433_v45 = vmul.u32 %v1429_v10, %v1428_v53 }
 0x19c   : > { %1538 = vst.msk [vmem:[%s2019_s25 + $0x20] sm:$0xff] %vm1533_vm5, %v1067_v59  ;;  %v1335_v35 = vshrl.u32 %v1317_v40, %v1333_v18  ;;  %v1338_v42 = vadd.s32 127, %v1337_v63  ;;  %v1431_v29 = vmul.u32 %v1429_v10, %v1427_v13  ;;  %v1434_v5 = vmul.u32 %v1430_v7, %v1428_v53 }
 0x19d   : > { %v1457_v33 = vshll.u32 %v1454_v58, 16  ;;  %v1435_v51 = vshll.u32 %v1432_v12, 16  ;;  %v1456_v31 = vmul.u32 %v1452_v37, %v1428_v53  ;;  %v1459_v43 = vshll.u32 %v1455_v60, 16 }
 0x19e   : > { %v1336_v57 = vor.u32 %v1335_v35, %v1334_v34  ;;  %v1339_v46 = vshll.u32 %v1338_v42, 23  ;;  %v1437_v23 = vshll.u32 %v1433_v45, 16  ;;  %v1414_v19 = vsel %vm1410_vm11, %v1394_v44, %v2523_v30 }
 0x19f   : > { %vm1461_vm3 = vc.u32 %v1453_v21, %v1457_v33  ;;  %v1463_v50 = vadd.s32 %v1457_v33, %v1453_v21  ;;  %vm1439_vm7 = vc.u32 %v1431_v29, %v1435_v51  ;;  %v1441_v48 = vadd.s32 %v1435_v51, %v1431_v29 }
 0x1a0   : > { %v1340_v24 = vor.u32 4788187, %v1339_v46  ;;  %v1343_v49 = vcvt.s32.f32 %v1336_v57  ;;  %v1462_v14 = vsel %vm1461_vm3, 1, %v1665_v0  ;;  %v1440_v54 = vsel %vm1439_vm7, 1, %v1665_v0 }
 0x1a1   : > { %v1464_v40 = vadd.s32 %v1462_v14, %v1456_v31  ;;  %vm1465_vm8 = vc.u32 %v1463_v50, %v1459_v43  ;;  %v1442_v26 = vadd.s32 %v1440_v54, %v1434_v5  ;;  %vm1443_vm9 = vc.u32 %v1441_v48, %v1437_v23 }
 0x1a2   : > { %v1341_v15 = vand.u32 2147483647, %v1340_v24  ;;  %v1466_v2 = vsel %vm1465_vm8, 1, %v1665_v0  ;;  %v1444_v9 = vsel %vm1443_vm9, 1, %v1665_v0  ;;  %v1458_v11 = vshrl.u32 %v1454_v58, 16 }
 0x1a3   : > { %v1468_v38 = vadd.s32 %v1466_v2, %v1464_v40  ;;  %v1416_v39 = vsel %vm1412_vm1, %v2525_v55, %v1415_v27  ;;  %v1436_v30 = vshrl.u32 %v1432_v12, 16  ;;  %v1446_v22 = vadd.s32 %v1444_v9, %v1442_v26 }
 0x1a4   : > { %v1344_v61 = vmul.f32 %v1343_v49, %v1341_v15  ;;  %v1460_v63 = vshrl.u32 %v1455_v60, 16  ;;  %v1438_v34 = vshrl.u32 %v1433_v45, 16  ;;  %v1417_v0 = vsel %vm1411_vm4, %v1414_v19, %v1416_v39 }
 0x1a5   : > { %v1469_v59 = vadd.s32 %v1468_v38, %v1458_v11  ;;  %v1447_v47 = vadd.s32 %v1446_v22, %v1436_v30  ;;  %v1348_v36 = vsel %vm1225_vm6, %v1347_v3, %v2501_v6  ;;  %v1467_v4 = vadd.s32 %v1463_v50, %v1459_v43 }
 0x1a6   : > { %v1345_v52 = vxor.u32 2147483648, %v1344_v61  ;;  %v1471_v57 = vmul.u32 %v2530_v32, %v1417_v0  ;;  %v1350_v46 = vsel %vm2566_vm2, 0, %v1348_v36  ;;  %vm1366_vm15 = vweird.f32 %v2248_v28 }
 0x1a7   : > { %v1470_v42 = vadd.s32 %v1469_v59, %v1460_v63  ;;  %v1448_v62 = vadd.s32 %v1447_v47, %v1438_v34  ;;  %v1367_v24 = vadd.s32 3, %v1350_v46  ;;  %vm1380_vm1 = vcmp.lt.s32.totalorder %v2477_v17, 0 }
 0x1a8   : > { %v1346_v56 = vsel %vm1225_vm6, %v1345_v52, %v1344_v61  ;;  %vm1379_vm4 = vcmp.le.f32.partialorder %v1378_v16, 0.7853982  ;;  %vm1521_vm7 = vweird.f32 %v2477_v17 }
 0x1a9   : > { %v1349_v41 = vsel %vm2566_vm2, %v2248_v28, %v1346_v56  ;;  %v1474_v37 = vadd.s32 1, %v1470_v42  ;;  %vm1473_vm10 = vc.u32 %v1448_v62, %v1467_v4  ;;  %v1368_v45 = vand.u32 3, %v1367_v24 }
 0x1aa   : > { %v1351_v18 = vmul.f32 %v1349_v41, %v1349_v41  ;;  %v1472_v48 = vadd.s32 %v1467_v4, %v1448_v62 }
 0x1ab   : > { %v1475_v8 = vsel %vm1473_vm10, %v1474_v37, %v1470_v42  ;;  %vm1370_vm12 = vcmp.eq.s32.totalorder %v1368_v45, 0  ;;  %vm1373_vm13 = vcmp.eq.s32.totalorder %v1368_v45, 2  ;;  %vm1369_vm11 = vcmp.lt.s32.totalorder %v1368_v45, 2 }
 0x1ac   : > { %v1352_v25 = vmul.f32 -0.001358992, %v1351_v18  ;;  %v1359_v35 = vmul.f32 -0.00019511016, %v1351_v18  ;;  %v1476_v10 = vadd.s32 %v1475_v8, %v1471_v57 }
 0x1ae   : > { %v1353_v55 = vadd.f32 0.041655596, %v1352_v25  ;;  %v1360_v13 = vadd.f32 0.008332121, %v1359_v35  ;;  %v1477_v60 = vadd.s32 536870912, %v1476_v10 }
 0x1b0   : > { %v1354_v1 = vmul.f32 %v1353_v55, %v1351_v18  ;;  %v1361_v53 = vmul.f32 %v1360_v13, %v1351_v18  ;;  %v1478_v44 = vshrl.u32 %v1477_v60, 30 }
 0x1b2   : > { %v1355_v7 = vadd.f32 -0.4999988, %v1354_v1  ;;  %v1362_v58 = vadd.f32 -0.16666654, %v1361_v53  ;;  %v1479_v15 = vshll.u32 %v1478_v44, 30  ;;  %v1502_v39 = vsub.s32 4, %v1478_v44 }
 0x1b4   : > { %v1356_v6 = vmul.f32 %v1355_v7, %v1351_v18  ;;  %v1363_v3 = vmul.f32 %v1362_v58, %v1351_v18  ;;  %v1480_v20 = vsub.s32 %v1476_v10, %v1479_v15  ;;  %v1503_v59 = vsel %vm1380_vm1, %v1502_v39, %v1478_v44 }
 0x1b5   : > { %v1505_v25 = vsel %vm1379_vm4, 0, %v1503_v59 }
 0x1b6   : > { %v1357_v27 = vadd.f32 1.0, %v1356_v6  ;;  %v1364_v12 = vadd.f32 1.0, %v1363_v3  ;;  %vm1481_vm14 = vcmp.lt.s32.totalorder %v1480_v20, 0  ;;  %v1482_v33 = vsub.s32 0, %v1480_v20 }
 0x1b7   : > { %v1522_v62 = vadd.s32 3, %v1505_v25 }
 0x1b8   : > { %v1365_v32 = vmul.f32 %v1364_v12, %v1349_v41  ;;  %v1374_v49 = vxor.u32 2147483648, %v1357_v27  ;;  %v1483_v31 = vsel %vm1481_vm14, %v1482_v33, %v1480_v20 }
 0x1b9   : > { %v1484_v43 = vclz %v1483_v31  ;;  %v1523_v37 = vand.u32 3, %v1522_v62 }
 0x1ba   : > { %v1371_v21 = vxor.u32 2147483648, %v1365_v32  ;;  %v1375_v5 = vsel %vm1373_vm13, %v1374_v49, %v1365_v32 }
 0x1bb   : > { %v1629_v50 = vadd.s32 4294967294, %v1484_v43  ;;  %vm1525_vm6 = vcmp.eq.s32.totalorder %v1523_v37, 0  ;;  %vm1528_vm2 = vcmp.eq.s32.totalorder %v1523_v37, 2  ;;  %vm1524_vm3 = vcmp.lt.s32.totalorder %v1523_v37, 2 }
 0x1bc   : > { %v1372_v29 = vsel %vm1370_vm12, %v1357_v27, %v1371_v21 }
 0x1bd   : > { %v1376_v51 = vsel %vm1369_vm11, %v1372_v29, %v1375_v5  ;;  %vm1630_vm0 = vcmp.lt.s32.totalorder %v1629_v50, 0 }
 0x1be   : > { %v1377_v61 = vsel %vm1366_vm15, nan, %v1376_v51  ;;  %v1487_v23 = vsel %vm1630_vm0, 0, %v1629_v50 }
 0x1bf   : > { %1540 = vst.msk [vmem:[%s2019_s25 + $0x30] sm:$0xff] %vm1533_vm5, %v1377_v61  ;;  %v1488_v14 = vsub.s32 32, %v1487_v23  ;;  %v1492_v52 = vsub.s32 4294967266, %v1487_v23  ;;  %v1489_v54 = vshll.u32 %v1480_v20, %v1487_v23 }
 0x1c1   : > { %v1490_v40 = vshrl.u32 %v1472_v48, %v1488_v14  ;;  %v1493_v19 = vadd.s32 127, %v1492_v52 }
 0x1c3   : > { %v1491_v26 = vor.u32 %v1490_v40, %v1489_v54  ;;  %v1494_v2 = vshll.u32 %v1493_v19, 23 }
 0x1c5   : > { %v1495_v56 = vor.u32 4788187, %v1494_v2  ;;  %v1498_v28 = vcvt.s32.f32 %v1491_v26 }
 0x1c7   : > { %v1496_v9 = vand.u32 2147483647, %v1495_v56 }
 0x1c9   : > { %v1499_v11 = vmul.f32 %v1498_v28, %v1496_v9 }
 0x1cb   : > { %v1500_v38 = vxor.u32 2147483648, %v1499_v11 }
 0x1cd   : > { %v1501_v41 = vsel %vm1380_vm1, %v1500_v38, %v1499_v11 }
 0x1ce   : > { %v1504_v30 = vsel %vm1379_vm4, %v2477_v17, %v1501_v41 }
 0x1cf   : > { %v1506_v22 = vmul.f32 %v1504_v30, %v1504_v30 }
 0x1d1   : > { %v1507_v18 = vmul.f32 -0.001358992, %v1506_v22  ;;  %v1514_v63 = vmul.f32 -0.00019511016, %v1506_v22 }
 0x1d3   : > { %v1508_v34 = vadd.f32 0.041655596, %v1507_v18  ;;  %v1515_v47 = vadd.f32 0.008332121, %v1514_v63 }
 0x1d5   : > { %v1509_v35 = vmul.f32 %v1508_v34, %v1506_v22  ;;  %v1516_v0 = vmul.f32 %v1515_v47, %v1506_v22 }
 0x1d7   : > { %v1510_v42 = vadd.f32 -0.4999988, %v1509_v35  ;;  %v1517_v36 = vadd.f32 -0.16666654, %v1516_v0 }
 0x1d9   : > { %v1511_v4 = vmul.f32 %v1510_v42, %v1506_v22  ;;  %v1518_v55 = vmul.f32 %v1517_v36, %v1506_v22 }
 0x1db   : > { %v1512_v16 = vadd.f32 1.0, %v1511_v4  ;;  %v1519_v13 = vadd.f32 1.0, %v1518_v55 }
 0x1dd   : > { %v1520_v57 = vmul.f32 %v1519_v13, %v1504_v30  ;;  %v1529_v46 = vxor.u32 2147483648, %v1512_v16 }
 0x1df   : > { %v1526_v1 = vxor.u32 2147483648, %v1520_v57  ;;  %v1530_v8 = vsel %vm1528_vm2, %v1529_v46, %v1520_v57 }
 0x1e1   : > { %v1527_v53 = vsel %vm1525_vm6, %v1512_v16, %v1526_v1 }
 0x1e2   : > { %v1531_v10 = vsel %vm1524_vm3, %v1527_v53, %v1530_v8 }
 0x1e3   : > { %v1532_v7 = vsel %vm1521_vm7, nan, %v1531_v10 }
 0x1e4   : > { %1541 = vst.msk [vmem:[%s2019_s25 + $0x38] sm:$0xff] %vm1533_vm5, %v1532_v7 }
 0x1e5 PF: > { %s13_s12 = sadd.s32 1, %s1663_s12  }
 0x1e6   : > { %p10_p4 = scmp.ge.s32.totalorder %s13_s12, 4  }
 0x1e8   :  { %12 = sbr.rel (!%p10_p4) target bundleno = 1 (0x1), region = 62 }

</bundles_post_ra>
